<compile_context>
chip_gen: v7x
topology: tpu7x:2x2x1
jax: 0.10.0
libtpu: 0.0.40
codegen_flags: <defaults>
</compile_context>

<pallas_src>
import functools

import jax
import jax.numpy as jnp
from jax.experimental import pallas as pl
from jax.experimental.pallas import tpu as pltpu


ROW_TILE = 512                  # rows (batch) per grid step for large B (multiple of 8)
MAX_ACT_TILE_BYTES = 4 << 20    # cap on tb * widest_layer * 4 B (live-activation gate)


def _round_up(a, m):
    return ((a + m - 1) // m) * m


# ----------------------------------------------------------------------------
# Fused kernel: per-point ten-MLP (unrolled over points) -> squeeze -> dense MLP
# ----------------------------------------------------------------------------
def _fused_kernel(*refs, n_points, ten_dims, lin_act, compute_dtype):
    """refs = (x_ref, w0, b0, ..., w_{L-1}, b_{L-1}, o_ref, h2_scratch)."""
    n_ten = len(ten_dims) - 1
    n_layers = n_ten + len(lin_act)

    x_ref = refs[0]
    o_ref = refs[1 + 2 * n_layers]
    h2_ref = refs[2 + 2 * n_layers]                        # (tb, N) VMEM scratch

    # Load every grid-invariant weight/bias ONCE, hoisted out of the point loop.
    ws = [refs[1 + 2 * i][...] for i in range(n_layers)]   # compute_dtype
    bs = [refs[2 + 2 * i][...] for i in range(n_layers)]   # (1, F) float32

    k0 = ten_dims[0]

    # --- Stage 1: per-point tensor MLP, tanh after EVERY Linear --------------
    # Point-by-point 2-D matmuls replace the old kron(I_N, W) formulation.
    # squeeze(2): the (tb, 1) result of point n lands in column n of h2_ref.
    # TODO(synk): for very large N (many hundreds of points) switch this static
    # unroll to an in-kernel fori_loop / batched-einsum form to bound code size.
    for n in range(n_points):
        h = x_ref[:, n * k0:(n + 1) * k0]                  # (tb, K0) float32
        for i in range(n_ten):
            h = jnp.dot(h.astype(compute_dtype), ws[i],
                        preferred_element_type=jnp.float32) + bs[i]
            h = jnp.tanh(h)                                # f32 tanh (v5e-safe)
        h2_ref[:, n:n + 1] = h                             # (tb, 1) -> column n

    # --- Stage 2: dense MLP on the squeezed (tb, N) features ------------------
    h = h2_ref[...]
    for j, act in enumerate(lin_act):
        i = n_ten + j
        h = jnp.dot(h.astype(compute_dtype), ws[i],
                    preferred_element_type=jnp.float32) + bs[i]
        if act:
            h = jnp.tanh(h)
    o_ref[...] = h.astype(o_ref.dtype)


# ----------------------------------------------------------------------------
# pallas_call builder + wrapper
# ----------------------------------------------------------------------------
def _build_and_run(x2d, weights, biases, *, tb, n_points, ten_dims, lin_act,
                   compute_dtype, vmem_limit, single_buffer_params):
    m_pad, x_width = x2d.shape
    out_dim = weights[-1].shape[1]

    def const_spec(shape):
        # Grid-invariant blocks are fetched once; single-buffer them to halve
        # their VMEM footprint (no overlap is lost since they never change).
        if single_buffer_params:
            return pl.BlockSpec(shape, lambda i: (0, 0),
                                pipeline_mode=pl.Buffered(1))
        return pl.BlockSpec(shape, lambda i: (0, 0))

    in_specs = [pl.BlockSpec((tb, x_width), lambda i: (i, 0))]
    operands = [x2d]
    for w, b in zip(weights, biases):
        in_specs.append(const_spec(w.shape))
        in_specs.append(const_spec(b.shape))
        operands.extend((w, b))

    kernel = functools.partial(
        _fused_kernel, n_points=n_points, ten_dims=tuple(ten_dims),
        lin_act=tuple(lin_act), compute_dtype=compute_dtype)

    return pl.pallas_call(
        kernel,
        out_shape=jax.ShapeDtypeStruct((m_pad, out_dim), jnp.float32),
        grid=(m_pad // tb,),
        in_specs=in_specs,
        out_specs=pl.BlockSpec((tb, out_dim), lambda i: (i, 0)),
        scratch_shapes=[pltpu.VMEM((tb, n_points), jnp.float32)],
        compiler_params=pltpu.CompilerParams(
            dimension_semantics=("parallel",),
            vmem_limit_bytes=vmem_limit,
        ),
    )(*operands)


def _fused_mlp(x2d, weights, biases, *, n_points, ten_dims, lin_act,
               compute_dtype, row_tile=ROW_TILE):
    M, x_width = x2d.shape
    out_dim = weights[-1].shape[1]

    # ---- row-tile selection --------------------------------------------------
    max_width = max([x_width, n_points, out_dim] + [w.shape[1] for w in weights])
    tb = row_tile
    while tb > 8 and tb * max_width * 4 > MAX_ACT_TILE_BYTES:
        tb //= 2                       # keep the live activation small (spill gate)
    if M <= tb:
        # Small batch: still split into two >=8-row blocks so the "parallel"
        # grid axis can be sharded across both TensorCores on v7x.
        tb = _round_up(pl.cdiv(M, 2), 8) if M > 8 else M
    m_pad = _round_up(M, tb)
    if m_pad != M:                     # rows are independent -> zero-pad is safe
        x2d = jnp.pad(x2d, ((0, m_pad - M), (0, 0)))

    # ---- explicit scoped-VMEM budget (defaults are only 16/32 MiB) -----------
    param_bytes = sum(int(w.size) * w.dtype.itemsize + int(b.size) * b.dtype.itemsize
                      for w, b in zip(weights, biases))
    est = (2 * tb * x_width * x2d.dtype.itemsize      # double-buffered input tiles
           + 2 * tb * out_dim * 4                     # double-buffered output tiles
           + 2 * param_bytes                          # weights/biases (worst case 2x)
           + tb * n_points * 4                        # h2 scratch
           + 4 * tb * max_width * 4)                  # live activations + headroom
    vmem_limit = int(min(max(2 * est, 16 * 2**20), 100 * 2**20))

    kwargs = dict(tb=tb, n_points=n_points, ten_dims=ten_dims, lin_act=lin_act,
                  compute_dtype=compute_dtype, vmem_limit=vmem_limit)
    try:
        out = _build_and_run(x2d, weights, biases, single_buffer_params=True, **kwargs)
    except Exception:                  # pl.Buffered(1) unsupported -> default pipeline
        out = _build_and_run(x2d, weights, biases, single_buffer_params=False, **kwargs)
    return out[:M] if m_pad != M else out


# ----------------------------------------------------------------------------
# Parameter construction (deterministic, mirrors nn.Linear shapes)
# ----------------------------------------------------------------------------
def make_linear_params(key, fan_in, fan_out):
    kw, kb = jax.random.split(key)
    bound = 1.0 / jnp.sqrt(jnp.float32(fan_in))
    # stored as (in, out) == PyTorch weight.T, so the kernel computes x @ W + b
    w = jax.random.uniform(kw, (fan_in, fan_out), jnp.float32, -bound, bound)
    b = jax.random.uniform(kb, (1, fan_out), jnp.float32, -bound, bound)
    return w, b


def init_densenet_tensor(key, ten_layers, layers):
    ten_params, lin_params = [], []
    for k in range(len(ten_layers) - 1):
        key, sub = jax.random.split(key)
        ten_params.append(make_linear_params(sub, ten_layers[k], ten_layers[k + 1]))
    for j in range(len(layers) - 1):
        key, sub = jax.random.split(key)
        lin_params.append(make_linear_params(sub, layers[j], layers[j + 1]))
    return ten_params, lin_params


# ----------------------------------------------------------------------------
# Forward pass: tiny wrapper prep (reshape + dtype cast) + one fused Pallas call
# ----------------------------------------------------------------------------
def densenet_tensor_forward(x, ten_params, lin_params, *, compute_dtype=jnp.float32):
    """x: (B, N, K0).  nonlinearity is fixed to tanh (as used by NN2D)."""
    B, N, K0 = x.shape
    assert ten_params[0][0].shape[0] == K0
    assert ten_params[-1][0].shape[1] == 1, "squeeze(2) requires ten_layers[-1] == 1"
    assert lin_params[0][0].shape[0] == N, "layers[0] must equal the point count N"

    # Matmul operands in compute_dtype (bf16 halves weight VMEM and runs the MXU
    # at its native rate on v5e/v6e/v7x); biases/adds/tanh stay f32 and the
    # accumulation is always f32 via preferred_element_type.
    weights = ([w.astype(compute_dtype) for (w, _) in ten_params]
               + [w.astype(compute_dtype) for (w, _) in lin_params])
    biases = [b for (_, b) in ten_params] + [b for (_, b) in lin_params]

    ten_dims = [K0] + [w.shape[1] for (w, _) in ten_params]
    n_lin = len(lin_params)
    lin_act = [j != n_lin - 1 for j in range(n_lin)]

    x2d = x.reshape(B, N * K0)    # point-major flattening: point n -> cols [n*K0,(n+1)*K0)
    return _fused_mlp(x2d, weights, biases, n_points=N, ten_dims=ten_dims,
                      lin_act=lin_act, compute_dtype=compute_dtype)


# ----------------------------------------------------------------------------
# Reference (pure JAX) for sanity check
# ----------------------------------------------------------------------------
def reference_forward(x, ten_params, lin_params):
    h = x
    for (w, b) in ten_params:
        h = jnp.tanh(h @ w + b[0])
    h = h[:, :, 0]
    n_lin = len(lin_params)
    for j, (w, b) in enumerate(lin_params):
        h = h @ w + b[0]
        if j != n_lin - 1:
            h = jnp.tanh(h)
    return h


if __name__ == "__main__":
    # Small shapes consistent with the module:
    #   ten_layers = [4, 32, 16, 1]  (tensor MLP; last width 1 so squeeze(2) works)
    #   layers     = [N, 32, 32, 3]  (layers[0] must equal N, the point count)
    B, N = 2, 8
    ten_layers = [4, 32, 16, 1]
    layers = [N, 32, 32, 3]

    key = jax.random.PRNGKey(0)
    key, kx = jax.random.split(key)
    x = jax.random.normal(kx, (B, N, ten_layers[0]), dtype=jnp.float32)

    ten_params, lin_params = init_densenet_tensor(key, ten_layers, layers)
    ref = reference_forward(x, ten_params, lin_params)

    # f32 path (tight check).
    out = jax.block_until_ready(densenet_tensor_forward(x, ten_params, lin_params))
    assert out.shape == (B, layers[-1]), out.shape
    assert jnp.allclose(out, ref, atol=1e-4, rtol=1e-4), "f32 kernel mismatch vs reference"

    # bf16-weights path (MXU-native on v5e/v6e/v7x), looser tolerance.
    out_bf16 = jax.block_until_ready(
        densenet_tensor_forward(x, ten_params, lin_params, compute_dtype=jnp.bfloat16))
    assert out_bf16.shape == (B, layers[-1]), out_bf16.shape
    assert jnp.allclose(out_bf16, ref, atol=5e-2, rtol=5e-2), "bf16 kernel mismatch vs reference"

    print("KERNEL_OK")
</pallas_src>

<mosaic_0001>
module attributes {stable_mosaic.version = 11 : i64} {
  func.func @_fused_kernel(%arg0: i32, %arg1: memref<2x32xf32, #tpu.memory_space<vmem>>, %arg2: memref<4x32xf32, #tpu.memory_space<vmem>>, %arg3: memref<1x32xf32, #tpu.memory_space<vmem>>, %arg4: memref<32x16xf32, #tpu.memory_space<vmem>>, %arg5: memref<1x16xf32, #tpu.memory_space<vmem>>, %arg6: memref<16x1xf32, #tpu.memory_space<vmem>>, %arg7: memref<1x1xf32, #tpu.memory_space<vmem>>, %arg8: memref<8x32xf32, #tpu.memory_space<vmem>>, %arg9: memref<1x32xf32, #tpu.memory_space<vmem>>, %arg10: memref<32x32xf32, #tpu.memory_space<vmem>>, %arg11: memref<1x32xf32, #tpu.memory_space<vmem>>, %arg12: memref<32x3xf32, #tpu.memory_space<vmem>>, %arg13: memref<1x3xf32, #tpu.memory_space<vmem>>, %arg14: memref<2x3xf32, #tpu.memory_space<vmem>>, %arg15: memref<2x8xf32, #tpu.memory_space<vmem>>) attributes {dimension_semantics = [#tpu.dimension_semantics<parallel>], iteration_bounds = array<i64: 1>, scalar_prefetch = 0 : i64, scratch_operands = 1 : i64, tpu.core_type = #tpu.core_type<tc>, window_params = [{transform_indices = @transform_0, window_bounds = array<i64: 2, 32>}, {pipeline_mode = #tpu.pipeline_mode<synchronous>, transform_indices = @transform_1, window_bounds = array<i64: 4, 32>}, {pipeline_mode = #tpu.pipeline_mode<synchronous>, transform_indices = @transform_2, window_bounds = array<i64: 1, 32>}, {pipeline_mode = #tpu.pipeline_mode<synchronous>, transform_indices = @transform_3, window_bounds = array<i64: 32, 16>}, {pipeline_mode = #tpu.pipeline_mode<synchronous>, transform_indices = @transform_4, window_bounds = array<i64: 1, 16>}, {pipeline_mode = #tpu.pipeline_mode<synchronous>, transform_indices = @transform_5, window_bounds = array<i64: 16, 1>}, {pipeline_mode = #tpu.pipeline_mode<synchronous>, transform_indices = @transform_6, window_bounds = array<i64: 1, 1>}, {pipeline_mode = #tpu.pipeline_mode<synchronous>, transform_indices = @transform_7, window_bounds = array<i64: 8, 32>}, {pipeline_mode = #tpu.pipeline_mode<synchronous>, transform_indices = @transform_8, window_bounds = array<i64: 1, 32>}, {pipeline_mode = #tpu.pipeline_mode<synchronous>, transform_indices = @transform_9, window_bounds = array<i64: 32, 32>}, {pipeline_mode = #tpu.pipeline_mode<synchronous>, transform_indices = @transform_10, window_bounds = array<i64: 1, 32>}, {pipeline_mode = #tpu.pipeline_mode<synchronous>, transform_indices = @transform_11, window_bounds = array<i64: 32, 3>}, {pipeline_mode = #tpu.pipeline_mode<synchronous>, transform_indices = @transform_12, window_bounds = array<i64: 1, 3>}, {transform_indices = @transform_13, window_bounds = array<i64: 2, 3>}]} {
    %c0 = arith.constant 0 : index
    %c0_0 = arith.constant 0 : index
    %0 = vector.load %arg2[%c0, %c0_0] : memref<4x32xf32, #tpu.memory_space<vmem>>, vector<4x32xf32>
    %c0_1 = arith.constant 0 : index
    %c0_2 = arith.constant 0 : index
    %1 = vector.load %arg4[%c0_1, %c0_2] : memref<32x16xf32, #tpu.memory_space<vmem>>, vector<32x16xf32>
    %c0_3 = arith.constant 0 : index
    %c0_4 = arith.constant 0 : index
    %2 = vector.load %arg6[%c0_3, %c0_4] : memref<16x1xf32, #tpu.memory_space<vmem>>, vector<16x1xf32>
    %c0_5 = arith.constant 0 : index
    %c0_6 = arith.constant 0 : index
    %3 = vector.load %arg8[%c0_5, %c0_6] : memref<8x32xf32, #tpu.memory_space<vmem>>, vector<8x32xf32>
    %c0_7 = arith.constant 0 : index
    %c0_8 = arith.constant 0 : index
    %4 = vector.load %arg10[%c0_7, %c0_8] : memref<32x32xf32, #tpu.memory_space<vmem>>, vector<32x32xf32>
    %c0_9 = arith.constant 0 : index
    %c0_10 = arith.constant 0 : index
    %5 = vector.load %arg12[%c0_9, %c0_10] : memref<32x3xf32, #tpu.memory_space<vmem>>, vector<32x3xf32>
    %c0_11 = arith.constant 0 : index
    %c0_12 = arith.constant 0 : index
    %6 = vector.load %arg3[%c0_11, %c0_12] : memref<1x32xf32, #tpu.memory_space<vmem>>, vector<1x32xf32>
    %c0_13 = arith.constant 0 : index
    %c0_14 = arith.constant 0 : index
    %7 = vector.load %arg5[%c0_13, %c0_14] : memref<1x16xf32, #tpu.memory_space<vmem>>, vector<1x16xf32>
    %c0_15 = arith.constant 0 : index
    %c0_16 = arith.constant 0 : index
    %8 = vector.load %arg7[%c0_15, %c0_16] : memref<1x1xf32, #tpu.memory_space<vmem>>, vector<1x1xf32>
    %c0_17 = arith.constant 0 : index
    %c0_18 = arith.constant 0 : index
    %9 = vector.load %arg9[%c0_17, %c0_18] : memref<1x32xf32, #tpu.memory_space<vmem>>, vector<1x32xf32>
    %c0_19 = arith.constant 0 : index
    %c0_20 = arith.constant 0 : index
    %10 = vector.load %arg11[%c0_19, %c0_20] : memref<1x32xf32, #tpu.memory_space<vmem>>, vector<1x32xf32>
    %c0_21 = arith.constant 0 : index
    %c0_22 = arith.constant 0 : index
    %11 = vector.load %arg13[%c0_21, %c0_22] : memref<1x3xf32, #tpu.memory_space<vmem>>, vector<1x3xf32>
    %c0_23 = arith.constant 0 : index
    %c0_24 = arith.constant 0 : index
    %12 = vector.load %arg1[%c0_23, %c0_24] : memref<2x32xf32, #tpu.memory_space<vmem>>, vector<2x4xf32>
    %cst = arith.constant dense<0.000000e+00> : vector<2x32xf32>
    %13 = tpu.matmul %12, %0, %cst {dimension_numbers = #tpu.dot_dimension_numbers<[1], [0], [0], [1], [0, 0, 1, 1], [], []>} : vector<2x4xf32>, vector<4x32xf32>, vector<2x32xf32> -> vector<2x32xf32>
    %14 = vector.broadcast %6 : vector<1x32xf32> to vector<2x32xf32>
    %15 = arith.addf %13, %14 : vector<2x32xf32>
    %16 = math.tanh %15 : vector<2x32xf32>
    %cst_25 = arith.constant dense<0.000000e+00> : vector<2x16xf32>
    %17 = tpu.matmul %16, %1, %cst_25 {dimension_numbers = #tpu.dot_dimension_numbers<[1], [0], [0], [1], [0, 0, 1, 1], [], []>} : vector<2x32xf32>, vector<32x16xf32>, vector<2x16xf32> -> vector<2x16xf32>
    %18 = vector.broadcast %7 : vector<1x16xf32> to vector<2x16xf32>
    %19 = arith.addf %17, %18 : vector<2x16xf32>
    %20 = math.tanh %19 : vector<2x16xf32>
    %cst_26 = arith.constant dense<0.000000e+00> : vector<2x1xf32>
    %21 = tpu.matmul %20, %2, %cst_26 {dimension_numbers = #tpu.dot_dimension_numbers<[1], [0], [0], [1], [0, 0, 1, 1], [], []>} : vector<2x16xf32>, vector<16x1xf32>, vector<2x1xf32> -> vector<2x1xf32>
    %22 = vector.broadcast %8 : vector<1x1xf32> to vector<2x1xf32>
    %23 = arith.addf %21, %22 : vector<2x1xf32>
    %24 = math.tanh %23 : vector<2x1xf32>
    %c0_27 = arith.constant 0 : index
    %c0_28 = arith.constant 0 : index
    %25 = vector.load %arg15[%c0_27, %c0_28] : memref<2x8xf32, #tpu.memory_space<vmem>>, vector<2x1xf32>
    tpu.vector_store %arg15[%c0_27, %c0_28], %24 {strides = array<i32>} : memref<2x8xf32, #tpu.memory_space<vmem>>, vector<2x1xf32>,
    %c0_29 = arith.constant 0 : index
    %c4 = arith.constant 4 : index
    %26 = vector.load %arg1[%c0_29, %c4] : memref<2x32xf32, #tpu.memory_space<vmem>>, vector<2x4xf32>
    %cst_30 = arith.constant dense<0.000000e+00> : vector<2x32xf32>
    %27 = tpu.matmul %26, %0, %cst_30 {dimension_numbers = #tpu.dot_dimension_numbers<[1], [0], [0], [1], [0, 0, 1, 1], [], []>} : vector<2x4xf32>, vector<4x32xf32>, vector<2x32xf32> -> vector<2x32xf32>
    %28 = vector.broadcast %6 : vector<1x32xf32> to vector<2x32xf32>
    %29 = arith.addf %27, %28 : vector<2x32xf32>
    %30 = math.tanh %29 : vector<2x32xf32>
    %cst_31 = arith.constant dense<0.000000e+00> : vector<2x16xf32>
    %31 = tpu.matmul %30, %1, %cst_31 {dimension_numbers = #tpu.dot_dimension_numbers<[1], [0], [0], [1], [0, 0, 1, 1], [], []>} : vector<2x32xf32>, vector<32x16xf32>, vector<2x16xf32> -> vector<2x16xf32>
    %32 = vector.broadcast %7 : vector<1x16xf32> to vector<2x16xf32>
    %33 = arith.addf %31, %32 : vector<2x16xf32>
    %34 = math.tanh %33 : vector<2x16xf32>
    %cst_32 = arith.constant dense<0.000000e+00> : vector<2x1xf32>
    %35 = tpu.matmul %34, %2, %cst_32 {dimension_numbers = #tpu.dot_dimension_numbers<[1], [0], [0], [1], [0, 0, 1, 1], [], []>} : vector<2x16xf32>, vector<16x1xf32>, vector<2x1xf32> -> vector<2x1xf32>
    %36 = vector.broadcast %8 : vector<1x1xf32> to vector<2x1xf32>
    %37 = arith.addf %35, %36 : vector<2x1xf32>
    %38 = math.tanh %37 : vector<2x1xf32>
    %c0_33 = arith.constant 0 : index
    %c1 = arith.constant 1 : index
    %39 = vector.load %arg15[%c0_33, %c1] : memref<2x8xf32, #tpu.memory_space<vmem>>, vector<2x1xf32>
    tpu.vector_store %arg15[%c0_33, %c1], %38 {strides = array<i32>} : memref<2x8xf32, #tpu.memory_space<vmem>>, vector<2x1xf32>,
    %c0_34 = arith.constant 0 : index
    %c8 = arith.constant 8 : index
    %40 = vector.load %arg1[%c0_34, %c8] : memref<2x32xf32, #tpu.memory_space<vmem>>, vector<2x4xf32>
    %cst_35 = arith.constant dense<0.000000e+00> : vector<2x32xf32>
    %41 = tpu.matmul %40, %0, %cst_35 {dimension_numbers = #tpu.dot_dimension_numbers<[1], [0], [0], [1], [0, 0, 1, 1], [], []>} : vector<2x4xf32>, vector<4x32xf32>, vector<2x32xf32> -> vector<2x32xf32>
    %42 = vector.broadcast %6 : vector<1x32xf32> to vector<2x32xf32>
    %43 = arith.addf %41, %42 : vector<2x32xf32>
    %44 = math.tanh %43 : vector<2x32xf32>
    %cst_36 = arith.constant dense<0.000000e+00> : vector<2x16xf32>
    %45 = tpu.matmul %44, %1, %cst_36 {dimension_numbers = #tpu.dot_dimension_numbers<[1], [0], [0], [1], [0, 0, 1, 1], [], []>} : vector<2x32xf32>, vector<32x16xf32>, vector<2x16xf32> -> vector<2x16xf32>
    %46 = vector.broadcast %7 : vector<1x16xf32> to vector<2x16xf32>
    %47 = arith.addf %45, %46 : vector<2x16xf32>
    %48 = math.tanh %47 : vector<2x16xf32>
    %cst_37 = arith.constant dense<0.000000e+00> : vector<2x1xf32>
    %49 = tpu.matmul %48, %2, %cst_37 {dimension_numbers = #tpu.dot_dimension_numbers<[1], [0], [0], [1], [0, 0, 1, 1], [], []>} : vector<2x16xf32>, vector<16x1xf32>, vector<2x1xf32> -> vector<2x1xf32>
    %50 = vector.broadcast %8 : vector<1x1xf32> to vector<2x1xf32>
    %51 = arith.addf %49, %50 : vector<2x1xf32>
    %52 = math.tanh %51 : vector<2x1xf32>
    %c0_38 = arith.constant 0 : index
    %c2 = arith.constant 2 : index
    %53 = vector.load %arg15[%c0_38, %c2] : memref<2x8xf32, #tpu.memory_space<vmem>>, vector<2x1xf32>
    tpu.vector_store %arg15[%c0_38, %c2], %52 {strides = array<i32>} : memref<2x8xf32, #tpu.memory_space<vmem>>, vector<2x1xf32>,
    %c0_39 = arith.constant 0 : index
    %c12 = arith.constant 12 : index
    %54 = vector.load %arg1[%c0_39, %c12] : memref<2x32xf32, #tpu.memory_space<vmem>>, vector<2x4xf32>
    %cst_40 = arith.constant dense<0.000000e+00> : vector<2x32xf32>
    %55 = tpu.matmul %54, %0, %cst_40 {dimension_numbers = #tpu.dot_dimension_numbers<[1], [0], [0], [1], [0, 0, 1, 1], [], []>} : vector<2x4xf32>, vector<4x32xf32>, vector<2x32xf32> -> vector<2x32xf32>
    %56 = vector.broadcast %6 : vector<1x32xf32> to vector<2x32xf32>
    %57 = arith.addf %55, %56 : vector<2x32xf32>
    %58 = math.tanh %57 : vector<2x32xf32>
    %cst_41 = arith.constant dense<0.000000e+00> : vector<2x16xf32>
    %59 = tpu.matmul %58, %1, %cst_41 {dimension_numbers = #tpu.dot_dimension_numbers<[1], [0], [0], [1], [0, 0, 1, 1], [], []>} : vector<2x32xf32>, vector<32x16xf32>, vector<2x16xf32> -> vector<2x16xf32>
    %60 = vector.broadcast %7 : vector<1x16xf32> to vector<2x16xf32>
    %61 = arith.addf %59, %60 : vector<2x16xf32>
    %62 = math.tanh %61 : vector<2x16xf32>
    %cst_42 = arith.constant dense<0.000000e+00> : vector<2x1xf32>
    %63 = tpu.matmul %62, %2, %cst_42 {dimension_numbers = #tpu.dot_dimension_numbers<[1], [0], [0], [1], [0, 0, 1, 1], [], []>} : vector<2x16xf32>, vector<16x1xf32>, vector<2x1xf32> -> vector<2x1xf32>
    %64 = vector.broadcast %8 : vector<1x1xf32> to vector<2x1xf32>
    %65 = arith.addf %63, %64 : vector<2x1xf32>
    %66 = math.tanh %65 : vector<2x1xf32>
    %c0_43 = arith.constant 0 : index
    %c3 = arith.constant 3 : index
    %67 = vector.load %arg15[%c0_43, %c3] : memref<2x8xf32, #tpu.memory_space<vmem>>, vector<2x1xf32>
    tpu.vector_store %arg15[%c0_43, %c3], %66 {strides = array<i32>} : memref<2x8xf32, #tpu.memory_space<vmem>>, vector<2x1xf32>,
    %c0_44 = arith.constant 0 : index
    %c16 = arith.constant 16 : index
    %68 = vector.load %arg1[%c0_44, %c16] : memref<2x32xf32, #tpu.memory_space<vmem>>, vector<2x4xf32>
    %cst_45 = arith.constant dense<0.000000e+00> : vector<2x32xf32>
    %69 = tpu.matmul %68, %0, %cst_45 {dimension_numbers = #tpu.dot_dimension_numbers<[1], [0], [0], [1], [0, 0, 1, 1], [], []>} : vector<2x4xf32>, vector<4x32xf32>, vector<2x32xf32> -> vector<2x32xf32>
    %70 = vector.broadcast %6 : vector<1x32xf32> to vector<2x32xf32>
    %71 = arith.addf %69, %70 : vector<2x32xf32>
    %72 = math.tanh %71 : vector<2x32xf32>
    %cst_46 = arith.constant dense<0.000000e+00> : vector<2x16xf32>
    %73 = tpu.matmul %72, %1, %cst_46 {dimension_numbers = #tpu.dot_dimension_numbers<[1], [0], [0], [1], [0, 0, 1, 1], [], []>} : vector<2x32xf32>, vector<32x16xf32>, vector<2x16xf32> -> vector<2x16xf32>
    %74 = vector.broadcast %7 : vector<1x16xf32> to vector<2x16xf32>
    %75 = arith.addf %73, %74 : vector<2x16xf32>
    %76 = math.tanh %75 : vector<2x16xf32>
    %cst_47 = arith.constant dense<0.000000e+00> : vector<2x1xf32>
    %77 = tpu.matmul %76, %2, %cst_47 {dimension_numbers = #tpu.dot_dimension_numbers<[1], [0], [0], [1], [0, 0, 1, 1], [], []>} : vector<2x16xf32>, vector<16x1xf32>, vector<2x1xf32> -> vector<2x1xf32>
    %78 = vector.broadcast %8 : vector<1x1xf32> to vector<2x1xf32>
    %79 = arith.addf %77, %78 : vector<2x1xf32>
    %80 = math.tanh %79 : vector<2x1xf32>
    %c0_48 = arith.constant 0 : index
    %c4_49 = arith.constant 4 : index
    %81 = vector.load %arg15[%c0_48, %c4_49] : memref<2x8xf32, #tpu.memory_space<vmem>>, vector<2x1xf32>
    tpu.vector_store %arg15[%c0_48, %c4_49], %80 {strides = array<i32>} : memref<2x8xf32, #tpu.memory_space<vmem>>, vector<2x1xf32>,
    %c0_50 = arith.constant 0 : index
    %c20 = arith.constant 20 : index
    %82 = vector.load %arg1[%c0_50, %c20] : memref<2x32xf32, #tpu.memory_space<vmem>>, vector<2x4xf32>
    %cst_51 = arith.constant dense<0.000000e+00> : vector<2x32xf32>
    %83 = tpu.matmul %82, %0, %cst_51 {dimension_numbers = #tpu.dot_dimension_numbers<[1], [0], [0], [1], [0, 0, 1, 1], [], []>} : vector<2x4xf32>, vector<4x32xf32>, vector<2x32xf32> -> vector<2x32xf32>
    %84 = vector.broadcast %6 : vector<1x32xf32> to vector<2x32xf32>
    %85 = arith.addf %83, %84 : vector<2x32xf32>
    %86 = math.tanh %85 : vector<2x32xf32>
    %cst_52 = arith.constant dense<0.000000e+00> : vector<2x16xf32>
    %87 = tpu.matmul %86, %1, %cst_52 {dimension_numbers = #tpu.dot_dimension_numbers<[1], [0], [0], [1], [0, 0, 1, 1], [], []>} : vector<2x32xf32>, vector<32x16xf32>, vector<2x16xf32> -> vector<2x16xf32>
    %88 = vector.broadcast %7 : vector<1x16xf32> to vector<2x16xf32>
    %89 = arith.addf %87, %88 : vector<2x16xf32>
    %90 = math.tanh %89 : vector<2x16xf32>
    %cst_53 = arith.constant dense<0.000000e+00> : vector<2x1xf32>
    %91 = tpu.matmul %90, %2, %cst_53 {dimension_numbers = #tpu.dot_dimension_numbers<[1], [0], [0], [1], [0, 0, 1, 1], [], []>} : vector<2x16xf32>, vector<16x1xf32>, vector<2x1xf32> -> vector<2x1xf32>
    %92 = vector.broadcast %8 : vector<1x1xf32> to vector<2x1xf32>
    %93 = arith.addf %91, %92 : vector<2x1xf32>
    %94 = math.tanh %93 : vector<2x1xf32>
    %c0_54 = arith.constant 0 : index
    %c5 = arith.constant 5 : index
    %95 = vector.load %arg15[%c0_54, %c5] : memref<2x8xf32, #tpu.memory_space<vmem>>, vector<2x1xf32>
    tpu.vector_store %arg15[%c0_54, %c5], %94 {strides = array<i32>} : memref<2x8xf32, #tpu.memory_space<vmem>>, vector<2x1xf32>,
    %c0_55 = arith.constant 0 : index
    %c24 = arith.constant 24 : index
    %96 = vector.load %arg1[%c0_55, %c24] : memref<2x32xf32, #tpu.memory_space<vmem>>, vector<2x4xf32>
    %cst_56 = arith.constant dense<0.000000e+00> : vector<2x32xf32>
    %97 = tpu.matmul %96, %0, %cst_56 {dimension_numbers = #tpu.dot_dimension_numbers<[1], [0], [0], [1], [0, 0, 1, 1], [], []>} : vector<2x4xf32>, vector<4x32xf32>, vector<2x32xf32> -> vector<2x32xf32>
    %98 = vector.broadcast %6 : vector<1x32xf32> to vector<2x32xf32>
    %99 = arith.addf %97, %98 : vector<2x32xf32>
    %100 = math.tanh %99 : vector<2x32xf32>
    %cst_57 = arith.constant dense<0.000000e+00> : vector<2x16xf32>
    %101 = tpu.matmul %100, %1, %cst_57 {dimension_numbers = #tpu.dot_dimension_numbers<[1], [0], [0], [1], [0, 0, 1, 1], [], []>} : vector<2x32xf32>, vector<32x16xf32>, vector<2x16xf32> -> vector<2x16xf32>
    %102 = vector.broadcast %7 : vector<1x16xf32> to vector<2x16xf32>
    %103 = arith.addf %101, %102 : vector<2x16xf32>
    %104 = math.tanh %103 : vector<2x16xf32>
    %cst_58 = arith.constant dense<0.000000e+00> : vector<2x1xf32>
    %105 = tpu.matmul %104, %2, %cst_58 {dimension_numbers = #tpu.dot_dimension_numbers<[1], [0], [0], [1], [0, 0, 1, 1], [], []>} : vector<2x16xf32>, vector<16x1xf32>, vector<2x1xf32> -> vector<2x1xf32>
    %106 = vector.broadcast %8 : vector<1x1xf32> to vector<2x1xf32>
    %107 = arith.addf %105, %106 : vector<2x1xf32>
    %108 = math.tanh %107 : vector<2x1xf32>
    %c0_59 = arith.constant 0 : index
    %c6 = arith.constant 6 : index
    %109 = vector.load %arg15[%c0_59, %c6] : memref<2x8xf32, #tpu.memory_space<vmem>>, vector<2x1xf32>
    tpu.vector_store %arg15[%c0_59, %c6], %108 {strides = array<i32>} : memref<2x8xf32, #tpu.memory_space<vmem>>, vector<2x1xf32>,
    %c0_60 = arith.constant 0 : index
    %c28 = arith.constant 28 : index
    %110 = vector.load %arg1[%c0_60, %c28] : memref<2x32xf32, #tpu.memory_space<vmem>>, vector<2x4xf32>
    %cst_61 = arith.constant dense<0.000000e+00> : vector<2x32xf32>
    %111 = tpu.matmul %110, %0, %cst_61 {dimension_numbers = #tpu.dot_dimension_numbers<[1], [0], [0], [1], [0, 0, 1, 1], [], []>} : vector<2x4xf32>, vector<4x32xf32>, vector<2x32xf32> -> vector<2x32xf32>
    %112 = vector.broadcast %6 : vector<1x32xf32> to vector<2x32xf32>
    %113 = arith.addf %111, %112 : vector<2x32xf32>
    %114 = math.tanh %113 : vector<2x32xf32>
    %cst_62 = arith.constant dense<0.000000e+00> : vector<2x16xf32>
    %115 = tpu.matmul %114, %1, %cst_62 {dimension_numbers = #tpu.dot_dimension_numbers<[1], [0], [0], [1], [0, 0, 1, 1], [], []>} : vector<2x32xf32>, vector<32x16xf32>, vector<2x16xf32> -> vector<2x16xf32>
    %116 = vector.broadcast %7 : vector<1x16xf32> to vector<2x16xf32>
    %117 = arith.addf %115, %116 : vector<2x16xf32>
    %118 = math.tanh %117 : vector<2x16xf32>
    %cst_63 = arith.constant dense<0.000000e+00> : vector<2x1xf32>
    %119 = tpu.matmul %118, %2, %cst_63 {dimension_numbers = #tpu.dot_dimension_numbers<[1], [0], [0], [1], [0, 0, 1, 1], [], []>} : vector<2x16xf32>, vector<16x1xf32>, vector<2x1xf32> -> vector<2x1xf32>
    %120 = vector.broadcast %8 : vector<1x1xf32> to vector<2x1xf32>
    %121 = arith.addf %119, %120 : vector<2x1xf32>
    %122 = math.tanh %121 : vector<2x1xf32>
    %c0_64 = arith.constant 0 : index
    %c7 = arith.constant 7 : index
    %123 = vector.load %arg15[%c0_64, %c7] : memref<2x8xf32, #tpu.memory_space<vmem>>, vector<2x1xf32>
    tpu.vector_store %arg15[%c0_64, %c7], %122 {strides = array<i32>} : memref<2x8xf32, #tpu.memory_space<vmem>>, vector<2x1xf32>,
    %c0_65 = arith.constant 0 : index
    %c0_66 = arith.constant 0 : index
    %124 = vector.load %arg15[%c0_65, %c0_66] : memref<2x8xf32, #tpu.memory_space<vmem>>, vector<2x8xf32>
    %cst_67 = arith.constant dense<0.000000e+00> : vector<2x32xf32>
    %125 = tpu.matmul %124, %3, %cst_67 {dimension_numbers = #tpu.dot_dimension_numbers<[1], [0], [0], [1], [0, 0, 1, 1], [], []>} : vector<2x8xf32>, vector<8x32xf32>, vector<2x32xf32> -> vector<2x32xf32>
    %126 = vector.broadcast %9 : vector<1x32xf32> to vector<2x32xf32>
    %127 = arith.addf %125, %126 : vector<2x32xf32>
    %128 = math.tanh %127 : vector<2x32xf32>
    %cst_68 = arith.constant dense<0.000000e+00> : vector<2x32xf32>
    %129 = tpu.matmul %128, %4, %cst_68 {dimension_numbers = #tpu.dot_dimension_numbers<[1], [0], [0], [1], [0, 0, 1, 1], [], []>} : vector<2x32xf32>, vector<32x32xf32>, vector<2x32xf32> -> vector<2x32xf32>
    %130 = vector.broadcast %10 : vector<1x32xf32> to vector<2x32xf32>
    %131 = arith.addf %129, %130 : vector<2x32xf32>
    %132 = math.tanh %131 : vector<2x32xf32>
    %cst_69 = arith.constant dense<0.000000e+00> : vector<2x3xf32>
    %133 = tpu.matmul %132, %5, %cst_69 {dimension_numbers = #tpu.dot_dimension_numbers<[1], [0], [0], [1], [0, 0, 1, 1], [], []>} : vector<2x32xf32>, vector<32x3xf32>, vector<2x3xf32> -> vector<2x3xf32>
    %134 = vector.broadcast %11 : vector<1x3xf32> to vector<2x3xf32>
    %135 = arith.addf %133, %134 : vector<2x3xf32>
    %c0_70 = arith.constant 0 : index
    %c0_71 = arith.constant 0 : index
    %136 = vector.load %arg14[%c0_70, %c0_71] : memref<2x3xf32, #tpu.memory_space<vmem>>, vector<2x3xf32>
    tpu.vector_store %arg14[%c0_70, %c0_71], %135 {strides = array<i32>} : memref<2x3xf32, #tpu.memory_space<vmem>>, vector<2x3xf32>,
    return
  }
  func.func @transform_0(%arg0: i32) -> (i32, i32) {
    %c0_i32 = arith.constant 0 : i32
    %c0_i32_0 = arith.constant 0 : i32
    return %arg0, %c0_i32 : i32, i32
  }
  func.func @transform_1(%arg0: i32) -> (i32, i32) {
    %c0_i32 = arith.constant 0 : i32
    %c0_i32_0 = arith.constant 0 : i32
    %c0_i32_1 = arith.constant 0 : i32
    return %c0_i32, %c0_i32_0 : i32, i32
  }
  func.func @transform_2(%arg0: i32) -> (i32, i32) {
    %c0_i32 = arith.constant 0 : i32
    %c0_i32_0 = arith.constant 0 : i32
    %c0_i32_1 = arith.constant 0 : i32
    return %c0_i32, %c0_i32_0 : i32, i32
  }
  func.func @transform_3(%arg0: i32) -> (i32, i32) {
    %c0_i32 = arith.constant 0 : i32
    %c0_i32_0 = arith.constant 0 : i32
    %c0_i32_1 = arith.constant 0 : i32
    return %c0_i32, %c0_i32_0 : i32, i32
  }
  func.func @transform_4(%arg0: i32) -> (i32, i32) {
    %c0_i32 = arith.constant 0 : i32
    %c0_i32_0 = arith.constant 0 : i32
    %c0_i32_1 = arith.constant 0 : i32
    return %c0_i32, %c0_i32_0 : i32, i32
  }
  func.func @transform_5(%arg0: i32) -> (i32, i32) {
    %c0_i32 = arith.constant 0 : i32
    %c0_i32_0 = arith.constant 0 : i32
    %c0_i32_1 = arith.constant 0 : i32
    return %c0_i32, %c0_i32_0 : i32, i32
  }
  func.func @transform_6(%arg0: i32) -> (i32, i32) {
    %c0_i32 = arith.constant 0 : i32
    %c0_i32_0 = arith.constant 0 : i32
    %c0_i32_1 = arith.constant 0 : i32
    return %c0_i32, %c0_i32_0 : i32, i32
  }
  func.func @transform_7(%arg0: i32) -> (i32, i32) {
    %c0_i32 = arith.constant 0 : i32
    %c0_i32_0 = arith.constant 0 : i32
    %c0_i32_1 = arith.constant 0 : i32
    return %c0_i32, %c0_i32_0 : i32, i32
  }
  func.func @transform_8(%arg0: i32) -> (i32, i32) {
    %c0_i32 = arith.constant 0 : i32
    %c0_i32_0 = arith.constant 0 : i32
    %c0_i32_1 = arith.constant 0 : i32
    return %c0_i32, %c0_i32_0 : i32, i32
  }
  func.func @transform_9(%arg0: i32) -> (i32, i32) {
    %c0_i32 = arith.constant 0 : i32
    %c0_i32_0 = arith.constant 0 : i32
    %c0_i32_1 = arith.constant 0 : i32
    return %c0_i32, %c0_i32_0 : i32, i32
  }
  func.func @transform_10(%arg0: i32) -> (i32, i32) {
    %c0_i32 = arith.constant 0 : i32
    %c0_i32_0 = arith.constant 0 : i32
    %c0_i32_1 = arith.constant 0 : i32
    return %c0_i32, %c0_i32_0 : i32, i32
  }
  func.func @transform_11(%arg0: i32) -> (i32, i32) {
    %c0_i32 = arith.constant 0 : i32
    %c0_i32_0 = arith.constant 0 : i32
    %c0_i32_1 = arith.constant 0 : i32
    return %c0_i32, %c0_i32_0 : i32, i32
  }
  func.func @transform_12(%arg0: i32) -> (i32, i32) {
    %c0_i32 = arith.constant 0 : i32
    %c0_i32_0 = arith.constant 0 : i32
    %c0_i32_1 = arith.constant 0 : i32
    return %c0_i32, %c0_i32_0 : i32, i32
  }
  func.func @transform_13(%arg0: i32) -> (i32, i32) {
    %c0_i32 = arith.constant 0 : i32
    %c0_i32_0 = arith.constant 0 : i32
    return %arg0, %c0_i32 : i32, i32
  }
}

module attributes {stable_mosaic.version = 11 : i64} {
  func.func @_fused_kernel(%arg0: i32, %arg1: memref<2x32xf32, #tpu.memory_space<vmem>>, %arg2: memref<4x32xf32, #tpu.memory_space<vmem>>, %arg3: memref<1x32xf32, #tpu.memory_space<vmem>>, %arg4: memref<32x16xf32, #tpu.memory_space<vmem>>, %arg5: memref<1x16xf32, #tpu.memory_space<vmem>>, %arg6: memref<16x1xf32, #tpu.memory_space<vmem>>, %arg7: memref<1x1xf32, #tpu.memory_space<vmem>>, %arg8: memref<8x32xf32, #tpu.memory_space<vmem>>, %arg9: memref<1x32xf32, #tpu.memory_space<vmem>>, %arg10: memref<32x32xf32, #tpu.memory_space<vmem>>, %arg11: memref<1x32xf32, #tpu.memory_space<vmem>>, %arg12: memref<32x3xf32, #tpu.memory_space<vmem>>, %arg13: memref<1x3xf32, #tpu.memory_space<vmem>>, %arg14: memref<2x3xf32, #tpu.memory_space<vmem>>, %arg15: memref<2x8xf32, #tpu.memory_space<vmem>>) attributes {dimension_semantics = [#tpu.dimension_semantics<parallel>], iteration_bounds = array<i64: 1>, scalar_prefetch = 0 : i64, scratch_operands = 1 : i64, tpu.core_type = #tpu.core_type<tc>, window_params = [{transform_indices = @transform_0, window_bounds = array<i64: 2, 32>}, {pipeline_mode = #tpu.pipeline_mode<synchronous>, transform_indices = @transform_1, window_bounds = array<i64: 4, 32>}, {pipeline_mode = #tpu.pipeline_mode<synchronous>, transform_indices = @transform_2, window_bounds = array<i64: 1, 32>}, {pipeline_mode = #tpu.pipeline_mode<synchronous>, transform_indices = @transform_3, window_bounds = array<i64: 32, 16>}, {pipeline_mode = #tpu.pipeline_mode<synchronous>, transform_indices = @transform_4, window_bounds = array<i64: 1, 16>}, {pipeline_mode = #tpu.pipeline_mode<synchronous>, transform_indices = @transform_5, window_bounds = array<i64: 16, 1>}, {pipeline_mode = #tpu.pipeline_mode<synchronous>, transform_indices = @transform_6, window_bounds = array<i64: 1, 1>}, {pipeline_mode = #tpu.pipeline_mode<synchronous>, transform_indices = @transform_7, window_bounds = array<i64: 8, 32>}, {pipeline_mode = #tpu.pipeline_mode<synchronous>, transform_indices = @transform_8, window_bounds = array<i64: 1, 32>}, {pipeline_mode = #tpu.pipeline_mode<synchronous>, transform_indices = @transform_9, window_bounds = array<i64: 32, 32>}, {pipeline_mode = #tpu.pipeline_mode<synchronous>, transform_indices = @transform_10, window_bounds = array<i64: 1, 32>}, {pipeline_mode = #tpu.pipeline_mode<synchronous>, transform_indices = @transform_11, window_bounds = array<i64: 32, 3>}, {pipeline_mode = #tpu.pipeline_mode<synchronous>, transform_indices = @transform_12, window_bounds = array<i64: 1, 3>}, {transform_indices = @transform_13, window_bounds = array<i64: 2, 3>}]} {
    %c0 = arith.constant 0 : index
    %c0_0 = arith.constant 0 : index
    %0 = vector.load %arg2[%c0, %c0_0] : memref<4x32xf32, #tpu.memory_space<vmem>>, vector<4x32xf32>
    %c0_1 = arith.constant 0 : index
    %c0_2 = arith.constant 0 : index
    %1 = vector.load %arg4[%c0_1, %c0_2] : memref<32x16xf32, #tpu.memory_space<vmem>>, vector<32x16xf32>
    %c0_3 = arith.constant 0 : index
    %c0_4 = arith.constant 0 : index
    %2 = vector.load %arg6[%c0_3, %c0_4] : memref<16x1xf32, #tpu.memory_space<vmem>>, vector<16x1xf32>
    %c0_5 = arith.constant 0 : index
    %c0_6 = arith.constant 0 : index
    %3 = vector.load %arg8[%c0_5, %c0_6] : memref<8x32xf32, #tpu.memory_space<vmem>>, vector<8x32xf32>
    %c0_7 = arith.constant 0 : index
    %c0_8 = arith.constant 0 : index
    %4 = vector.load %arg10[%c0_7, %c0_8] : memref<32x32xf32, #tpu.memory_space<vmem>>, vector<32x32xf32>
    %c0_9 = arith.constant 0 : index
    %c0_10 = arith.constant 0 : index
    %5 = vector.load %arg12[%c0_9, %c0_10] : memref<32x3xf32, #tpu.memory_space<vmem>>, vector<32x3xf32>
    %c0_11 = arith.constant 0 : index
    %c0_12 = arith.constant 0 : index
    %6 = vector.load %arg3[%c0_11, %c0_12] : memref<1x32xf32, #tpu.memory_space<vmem>>, vector<1x32xf32>
    %c0_13 = arith.constant 0 : index
    %c0_14 = arith.constant 0 : index
    %7 = vector.load %arg5[%c0_13, %c0_14] : memref<1x16xf32, #tpu.memory_space<vmem>>, vector<1x16xf32>
    %c0_15 = arith.constant 0 : index
    %c0_16 = arith.constant 0 : index
    %8 = vector.load %arg7[%c0_15, %c0_16] : memref<1x1xf32, #tpu.memory_space<vmem>>, vector<1x1xf32>
    %c0_17 = arith.constant 0 : index
    %c0_18 = arith.constant 0 : index
    %9 = vector.load %arg9[%c0_17, %c0_18] : memref<1x32xf32, #tpu.memory_space<vmem>>, vector<1x32xf32>
    %c0_19 = arith.constant 0 : index
    %c0_20 = arith.constant 0 : index
    %10 = vector.load %arg11[%c0_19, %c0_20] : memref<1x32xf32, #tpu.memory_space<vmem>>, vector<1x32xf32>
    %c0_21 = arith.constant 0 : index
    %c0_22 = arith.constant 0 : index
    %11 = vector.load %arg13[%c0_21, %c0_22] : memref<1x3xf32, #tpu.memory_space<vmem>>, vector<1x3xf32>
    %c0_23 = arith.constant 0 : index
    %c0_24 = arith.constant 0 : index
    %12 = vector.load %arg1[%c0_23, %c0_24] : memref<2x32xf32, #tpu.memory_space<vmem>>, vector<2x4xf32>
    %cst = arith.constant dense<0.000000e+00> : vector<2x32xf32>
    %13 = tpu.matmul %12, %0, %cst {dimension_numbers = #tpu.dot_dimension_numbers<[1], [0], [0], [1], [0, 0, 1, 1], [], []>} : vector<2x4xf32>, vector<4x32xf32>, vector<2x32xf32> -> vector<2x32xf32>
    %14 = vector.broadcast %6 : vector<1x32xf32> to vector<2x32xf32>
    %15 = arith.addf %13, %14 : vector<2x32xf32>
    %16 = math.tanh %15 : vector<2x32xf32>
    %cst_25 = arith.constant dense<0.000000e+00> : vector<2x16xf32>
    %17 = tpu.matmul %16, %1, %cst_25 {dimension_numbers = #tpu.dot_dimension_numbers<[1], [0], [0], [1], [0, 0, 1, 1], [], []>} : vector<2x32xf32>, vector<32x16xf32>, vector<2x16xf32> -> vector<2x16xf32>
    %18 = vector.broadcast %7 : vector<1x16xf32> to vector<2x16xf32>
    %19 = arith.addf %17, %18 : vector<2x16xf32>
    %20 = math.tanh %19 : vector<2x16xf32>
    %cst_26 = arith.constant dense<0.000000e+00> : vector<2x1xf32>
    %21 = tpu.matmul %20, %2, %cst_26 {dimension_numbers = #tpu.dot_dimension_numbers<[1], [0], [0], [1], [0, 0, 1, 1], [], []>} : vector<2x16xf32>, vector<16x1xf32>, vector<2x1xf32> -> vector<2x1xf32>
    %22 = vector.broadcast %8 : vector<1x1xf32> to vector<2x1xf32>
    %23 = arith.addf %21, %22 : vector<2x1xf32>
    %24 = math.tanh %23 : vector<2x1xf32>
    %c0_27 = arith.constant 0 : index
    %c0_28 = arith.constant 0 : index
    %25 = vector.load %arg15[%c0_27, %c0_28] : memref<2x8xf32, #tpu.memory_space<vmem>>, vector<2x1xf32>
    tpu.vector_store %arg15[%c0_27, %c0_28], %24 {strides = array<i32>} : memref<2x8xf32, #tpu.memory_space<vmem>>, vector<2x1xf32>,
    %c0_29 = arith.constant 0 : index
    %c4 = arith.constant 4 : index
    %26 = vector.load %arg1[%c0_29, %c4] : memref<2x32xf32, #tpu.memory_space<vmem>>, vector<2x4xf32>
    %cst_30 = arith.constant dense<0.000000e+00> : vector<2x32xf32>
    %27 = tpu.matmul %26, %0, %cst_30 {dimension_numbers = #tpu.dot_dimension_numbers<[1], [0], [0], [1], [0, 0, 1, 1], [], []>} : vector<2x4xf32>, vector<4x32xf32>, vector<2x32xf32> -> vector<2x32xf32>
    %28 = vector.broadcast %6 : vector<1x32xf32> to vector<2x32xf32>
    %29 = arith.addf %27, %28 : vector<2x32xf32>
    %30 = math.tanh %29 : vector<2x32xf32>
    %cst_31 = arith.constant dense<0.000000e+00> : vector<2x16xf32>
    %31 = tpu.matmul %30, %1, %cst_31 {dimension_numbers = #tpu.dot_dimension_numbers<[1], [0], [0], [1], [0, 0, 1, 1], [], []>} : vector<2x32xf32>, vector<32x16xf32>, vector<2x16xf32> -> vector<2x16xf32>
    %32 = vector.broadcast %7 : vector<1x16xf32> to vector<2x16xf32>
    %33 = arith.addf %31, %32 : vector<2x16xf32>
    %34 = math.tanh %33 : vector<2x16xf32>
    %cst_32 = arith.constant dense<0.000000e+00> : vector<2x1xf32>
    %35 = tpu.matmul %34, %2, %cst_32 {dimension_numbers = #tpu.dot_dimension_numbers<[1], [0], [0], [1], [0, 0, 1, 1], [], []>} : vector<2x16xf32>, vector<16x1xf32>, vector<2x1xf32> -> vector<2x1xf32>
    %36 = vector.broadcast %8 : vector<1x1xf32> to vector<2x1xf32>
    %37 = arith.addf %35, %36 : vector<2x1xf32>
    %38 = math.tanh %37 : vector<2x1xf32>
    %c0_33 = arith.constant 0 : index
    %c1 = arith.constant 1 : index
    %39 = vector.load %arg15[%c0_33, %c1] : memref<2x8xf32, #tpu.memory_space<vmem>>, vector<2x1xf32>
    tpu.vector_store %arg15[%c0_33, %c1], %38 {strides = array<i32>} : memref<2x8xf32, #tpu.memory_space<vmem>>, vector<2x1xf32>,
    %c0_34 = arith.constant 0 : index
    %c8 = arith.constant 8 : index
    %40 = vector.load %arg1[%c0_34, %c8] : memref<2x32xf32, #tpu.memory_space<vmem>>, vector<2x4xf32>
    %cst_35 = arith.constant dense<0.000000e+00> : vector<2x32xf32>
    %41 = tpu.matmul %40, %0, %cst_35 {dimension_numbers = #tpu.dot_dimension_numbers<[1], [0], [0], [1], [0, 0, 1, 1], [], []>} : vector<2x4xf32>, vector<4x32xf32>, vector<2x32xf32> -> vector<2x32xf32>
    %42 = vector.broadcast %6 : vector<1x32xf32> to vector<2x32xf32>
    %43 = arith.addf %41, %42 : vector<2x32xf32>
    %44 = math.tanh %43 : vector<2x32xf32>
    %cst_36 = arith.constant dense<0.000000e+00> : vector<2x16xf32>
    %45 = tpu.matmul %44, %1, %cst_36 {dimension_numbers = #tpu.dot_dimension_numbers<[1], [0], [0], [1], [0, 0, 1, 1], [], []>} : vector<2x32xf32>, vector<32x16xf32>, vector<2x16xf32> -> vector<2x16xf32>
    %46 = vector.broadcast %7 : vector<1x16xf32> to vector<2x16xf32>
    %47 = arith.addf %45, %46 : vector<2x16xf32>
    %48 = math.tanh %47 : vector<2x16xf32>
    %cst_37 = arith.constant dense<0.000000e+00> : vector<2x1xf32>
    %49 = tpu.matmul %48, %2, %cst_37 {dimension_numbers = #tpu.dot_dimension_numbers<[1], [0], [0], [1], [0, 0, 1, 1], [], []>} : vector<2x16xf32>, vector<16x1xf32>, vector<2x1xf32> -> vector<2x1xf32>
    %50 = vector.broadcast %8 : vector<1x1xf32> to vector<2x1xf32>
    %51 = arith.addf %49, %50 : vector<2x1xf32>
    %52 = math.tanh %51 : vector<2x1xf32>
    %c0_38 = arith.constant 0 : index
    %c2 = arith.constant 2 : index
    %53 = vector.load %arg15[%c0_38, %c2] : memref<2x8xf32, #tpu.memory_space<vmem>>, vector<2x1xf32>
    tpu.vector_store %arg15[%c0_38, %c2], %52 {strides = array<i32>} : memref<2x8xf32, #tpu.memory_space<vmem>>, vector<2x1xf32>,
    %c0_39 = arith.constant 0 : index
    %c12 = arith.constant 12 : index
    %54 = vector.load %arg1[%c0_39, %c12] : memref<2x32xf32, #tpu.memory_space<vmem>>, vector<2x4xf32>
    %cst_40 = arith.constant dense<0.000000e+00> : vector<2x32xf32>
    %55 = tpu.matmul %54, %0, %cst_40 {dimension_numbers = #tpu.dot_dimension_numbers<[1], [0], [0], [1], [0, 0, 1, 1], [], []>} : vector<2x4xf32>, vector<4x32xf32>, vector<2x32xf32> -> vector<2x32xf32>
    %56 = vector.broadcast %6 : vector<1x32xf32> to vector<2x32xf32>
    %57 = arith.addf %55, %56 : vector<2x32xf32>
    %58 = math.tanh %57 : vector<2x32xf32>
    %cst_41 = arith.constant dense<0.000000e+00> : vector<2x16xf32>
    %59 = tpu.matmul %58, %1, %cst_41 {dimension_numbers = #tpu.dot_dimension_numbers<[1], [0], [0], [1], [0, 0, 1, 1], [], []>} : vector<2x32xf32>, vector<32x16xf32>, vector<2x16xf32> -> vector<2x16xf32>
    %60 = vector.broadcast %7 : vector<1x16xf32> to vector<2x16xf32>
    %61 = arith.addf %59, %60 : vector<2x16xf32>
    %62 = math.tanh %61 : vector<2x16xf32>
    %cst_42 = arith.constant dense<0.000000e+00> : vector<2x1xf32>
    %63 = tpu.matmul %62, %2, %cst_42 {dimension_numbers = #tpu.dot_dimension_numbers<[1], [0], [0], [1], [0, 0, 1, 1], [], []>} : vector<2x16xf32>, vector<16x1xf32>, vector<2x1xf32> -> vector<2x1xf32>
    %64 = vector.broadcast %8 : vector<1x1xf32> to vector<2x1xf32>
    %65 = arith.addf %63, %64 : vector<2x1xf32>
    %66 = math.tanh %65 : vector<2x1xf32>
    %c0_43 = arith.constant 0 : index
    %c3 = arith.constant 3 : index
    %67 = vector.load %arg15[%c0_43, %c3] : memref<2x8xf32, #tpu.memory_space<vmem>>, vector<2x1xf32>
    tpu.vector_store %arg15[%c0_43, %c3], %66 {strides = array<i32>} : memref<2x8xf32, #tpu.memory_space<vmem>>, vector<2x1xf32>,
    %c0_44 = arith.constant 0 : index
    %c16 = arith.constant 16 : index
    %68 = vector.load %arg1[%c0_44, %c16] : memref<2x32xf32, #tpu.memory_space<vmem>>, vector<2x4xf32>
    %cst_45 = arith.constant dense<0.000000e+00> : vector<2x32xf32>
    %69 = tpu.matmul %68, %0, %cst_45 {dimension_numbers = #tpu.dot_dimension_numbers<[1], [0], [0], [1], [0, 0, 1, 1], [], []>} : vector<2x4xf32>, vector<4x32xf32>, vector<2x32xf32> -> vector<2x32xf32>
    %70 = vector.broadcast %6 : vector<1x32xf32> to vector<2x32xf32>
    %71 = arith.addf %69, %70 : vector<2x32xf32>
    %72 = math.tanh %71 : vector<2x32xf32>
    %cst_46 = arith.constant dense<0.000000e+00> : vector<2x16xf32>
    %73 = tpu.matmul %72, %1, %cst_46 {dimension_numbers = #tpu.dot_dimension_numbers<[1], [0], [0], [1], [0, 0, 1, 1], [], []>} : vector<2x32xf32>, vector<32x16xf32>, vector<2x16xf32> -> vector<2x16xf32>
    %74 = vector.broadcast %7 : vector<1x16xf32> to vector<2x16xf32>
    %75 = arith.addf %73, %74 : vector<2x16xf32>
    %76 = math.tanh %75 : vector<2x16xf32>
    %cst_47 = arith.constant dense<0.000000e+00> : vector<2x1xf32>
    %77 = tpu.matmul %76, %2, %cst_47 {dimension_numbers = #tpu.dot_dimension_numbers<[1], [0], [0], [1], [0, 0, 1, 1], [], []>} : vector<2x16xf32>, vector<16x1xf32>, vector<2x1xf32> -> vector<2x1xf32>
    %78 = vector.broadcast %8 : vector<1x1xf32> to vector<2x1xf32>
    %79 = arith.addf %77, %78 : vector<2x1xf32>
    %80 = math.tanh %79 : vector<2x1xf32>
    %c0_48 = arith.constant 0 : index
    %c4_49 = arith.constant 4 : index
    %81 = vector.load %arg15[%c0_48, %c4_49] : memref<2x8xf32, #tpu.memory_space<vmem>>, vector<2x1xf32>
    tpu.vector_store %arg15[%c0_48, %c4_49], %80 {strides = array<i32>} : memref<2x8xf32, #tpu.memory_space<vmem>>, vector<2x1xf32>,
    %c0_50 = arith.constant 0 : index
    %c20 = arith.constant 20 : index
    %82 = vector.load %arg1[%c0_50, %c20] : memref<2x32xf32, #tpu.memory_space<vmem>>, vector<2x4xf32>
    %cst_51 = arith.constant dense<0.000000e+00> : vector<2x32xf32>
    %83 = tpu.matmul %82, %0, %cst_51 {dimension_numbers = #tpu.dot_dimension_numbers<[1], [0], [0], [1], [0, 0, 1, 1], [], []>} : vector<2x4xf32>, vector<4x32xf32>, vector<2x32xf32> -> vector<2x32xf32>
    %84 = vector.broadcast %6 : vector<1x32xf32> to vector<2x32xf32>
    %85 = arith.addf %83, %84 : vector<2x32xf32>
    %86 = math.tanh %85 : vector<2x32xf32>
    %cst_52 = arith.constant dense<0.000000e+00> : vector<2x16xf32>
    %87 = tpu.matmul %86, %1, %cst_52 {dimension_numbers = #tpu.dot_dimension_numbers<[1], [0], [0], [1], [0, 0, 1, 1], [], []>} : vector<2x32xf32>, vector<32x16xf32>, vector<2x16xf32> -> vector<2x16xf32>
    %88 = vector.broadcast %7 : vector<1x16xf32> to vector<2x16xf32>
    %89 = arith.addf %87, %88 : vector<2x16xf32>
    %90 = math.tanh %89 : vector<2x16xf32>
    %cst_53 = arith.constant dense<0.000000e+00> : vector<2x1xf32>
    %91 = tpu.matmul %90, %2, %cst_53 {dimension_numbers = #tpu.dot_dimension_numbers<[1], [0], [0], [1], [0, 0, 1, 1], [], []>} : vector<2x16xf32>, vector<16x1xf32>, vector<2x1xf32> -> vector<2x1xf32>
    %92 = vector.broadcast %8 : vector<1x1xf32> to vector<2x1xf32>
    %93 = arith.addf %91, %92 : vector<2x1xf32>
    %94 = math.tanh %93 : vector<2x1xf32>
    %c0_54 = arith.constant 0 : index
    %c5 = arith.constant 5 : index
    %95 = vector.load %arg15[%c0_54, %c5] : memref<2x8xf32, #tpu.memory_space<vmem>>, vector<2x1xf32>
    tpu.vector_store %arg15[%c0_54, %c5], %94 {strides = array<i32>} : memref<2x8xf32, #tpu.memory_space<vmem>>, vector<2x1xf32>,
    %c0_55 = arith.constant 0 : index
    %c24 = arith.constant 24 : index
    %96 = vector.load %arg1[%c0_55, %c24] : memref<2x32xf32, #tpu.memory_space<vmem>>, vector<2x4xf32>
    %cst_56 = arith.constant dense<0.000000e+00> : vector<2x32xf32>
    %97 = tpu.matmul %96, %0, %cst_56 {dimension_numbers = #tpu.dot_dimension_numbers<[1], [0], [0], [1], [0, 0, 1, 1], [], []>} : vector<2x4xf32>, vector<4x32xf32>, vector<2x32xf32> -> vector<2x32xf32>
    %98 = vector.broadcast %6 : vector<1x32xf32> to vector<2x32xf32>
    %99 = arith.addf %97, %98 : vector<2x32xf32>
    %100 = math.tanh %99 : vector<2x32xf32>
    %cst_57 = arith.constant dense<0.000000e+00> : vector<2x16xf32>
    %101 = tpu.matmul %100, %1, %cst_57 {dimension_numbers = #tpu.dot_dimension_numbers<[1], [0], [0], [1], [0, 0, 1, 1], [], []>} : vector<2x32xf32>, vector<32x16xf32>, vector<2x16xf32> -> vector<2x16xf32>
    %102 = vector.broadcast %7 : vector<1x16xf32> to vector<2x16xf32>
    %103 = arith.addf %101, %102 : vector<2x16xf32>
    %104 = math.tanh %103 : vector<2x16xf32>
    %cst_58 = arith.constant dense<0.000000e+00> : vector<2x1xf32>
    %105 = tpu.matmul %104, %2, %cst_58 {dimension_numbers = #tpu.dot_dimension_numbers<[1], [0], [0], [1], [0, 0, 1, 1], [], []>} : vector<2x16xf32>, vector<16x1xf32>, vector<2x1xf32> -> vector<2x1xf32>
    %106 = vector.broadcast %8 : vector<1x1xf32> to vector<2x1xf32>
    %107 = arith.addf %105, %106 : vector<2x1xf32>
    %108 = math.tanh %107 : vector<2x1xf32>
    %c0_59 = arith.constant 0 : index
    %c6 = arith.constant 6 : index
    %109 = vector.load %arg15[%c0_59, %c6] : memref<2x8xf32, #tpu.memory_space<vmem>>, vector<2x1xf32>
    tpu.vector_store %arg15[%c0_59, %c6], %108 {strides = array<i32>} : memref<2x8xf32, #tpu.memory_space<vmem>>, vector<2x1xf32>,
    %c0_60 = arith.constant 0 : index
    %c28 = arith.constant 28 : index
    %110 = vector.load %arg1[%c0_60, %c28] : memref<2x32xf32, #tpu.memory_space<vmem>>, vector<2x4xf32>
    %cst_61 = arith.constant dense<0.000000e+00> : vector<2x32xf32>
    %111 = tpu.matmul %110, %0, %cst_61 {dimension_numbers = #tpu.dot_dimension_numbers<[1], [0], [0], [1], [0, 0, 1, 1], [], []>} : vector<2x4xf32>, vector<4x32xf32>, vector<2x32xf32> -> vector<2x32xf32>
    %112 = vector.broadcast %6 : vector<1x32xf32> to vector<2x32xf32>
    %113 = arith.addf %111, %112 : vector<2x32xf32>
    %114 = math.tanh %113 : vector<2x32xf32>
    %cst_62 = arith.constant dense<0.000000e+00> : vector<2x16xf32>
    %115 = tpu.matmul %114, %1, %cst_62 {dimension_numbers = #tpu.dot_dimension_numbers<[1], [0], [0], [1], [0, 0, 1, 1], [], []>} : vector<2x32xf32>, vector<32x16xf32>, vector<2x16xf32> -> vector<2x16xf32>
    %116 = vector.broadcast %7 : vector<1x16xf32> to vector<2x16xf32>
    %117 = arith.addf %115, %116 : vector<2x16xf32>
    %118 = math.tanh %117 : vector<2x16xf32>
    %cst_63 = arith.constant dense<0.000000e+00> : vector<2x1xf32>
    %119 = tpu.matmul %118, %2, %cst_63 {dimension_numbers = #tpu.dot_dimension_numbers<[1], [0], [0], [1], [0, 0, 1, 1], [], []>} : vector<2x16xf32>, vector<16x1xf32>, vector<2x1xf32> -> vector<2x1xf32>
    %120 = vector.broadcast %8 : vector<1x1xf32> to vector<2x1xf32>
    %121 = arith.addf %119, %120 : vector<2x1xf32>
    %122 = math.tanh %121 : vector<2x1xf32>
    %c0_64 = arith.constant 0 : index
    %c7 = arith.constant 7 : index
    %123 = vector.load %arg15[%c0_64, %c7] : memref<2x8xf32, #tpu.memory_space<vmem>>, vector<2x1xf32>
    tpu.vector_store %arg15[%c0_64, %c7], %122 {strides = array<i32>} : memref<2x8xf32, #tpu.memory_space<vmem>>, vector<2x1xf32>,
    %c0_65 = arith.constant 0 : index
    %c0_66 = arith.constant 0 : index
    %124 = vector.load %arg15[%c0_65, %c0_66] : memref<2x8xf32, #tpu.memory_space<vmem>>, vector<2x8xf32>
    %cst_67 = arith.constant dense<0.000000e+00> : vector<2x32xf32>
    %125 = tpu.matmul %124, %3, %cst_67 {dimension_numbers = #tpu.dot_dimension_numbers<[1], [0], [0], [1], [0, 0, 1, 1], [], []>} : vector<2x8xf32>, vector<8x32xf32>, vector<2x32xf32> -> vector<2x32xf32>
    %126 = vector.broadcast %9 : vector<1x32xf32> to vector<2x32xf32>
    %127 = arith.addf %125, %126 : vector<2x32xf32>
    %128 = math.tanh %127 : vector<2x32xf32>
    %cst_68 = arith.constant dense<0.000000e+00> : vector<2x32xf32>
    %129 = tpu.matmul %128, %4, %cst_68 {dimension_numbers = #tpu.dot_dimension_numbers<[1], [0], [0], [1], [0, 0, 1, 1], [], []>} : vector<2x32xf32>, vector<32x32xf32>, vector<2x32xf32> -> vector<2x32xf32>
    %130 = vector.broadcast %10 : vector<1x32xf32> to vector<2x32xf32>
    %131 = arith.addf %129, %130 : vector<2x32xf32>
    %132 = math.tanh %131 : vector<2x32xf32>
    %cst_69 = arith.constant dense<0.000000e+00> : vector<2x3xf32>
    %133 = tpu.matmul %132, %5, %cst_69 {dimension_numbers = #tpu.dot_dimension_numbers<[1], [0], [0], [1], [0, 0, 1, 1], [], []>} : vector<2x32xf32>, vector<32x3xf32>, vector<2x3xf32> -> vector<2x3xf32>
    %134 = vector.broadcast %11 : vector<1x3xf32> to vector<2x3xf32>
    %135 = arith.addf %133, %134 : vector<2x3xf32>
    %c0_70 = arith.constant 0 : index
    %c0_71 = arith.constant 0 : index
    %136 = vector.load %arg14[%c0_70, %c0_71] : memref<2x3xf32, #tpu.memory_space<vmem>>, vector<2x3xf32>
    tpu.vector_store %arg14[%c0_70, %c0_71], %135 {strides = array<i32>} : memref<2x3xf32, #tpu.memory_space<vmem>>, vector<2x3xf32>,
    return
  }
  func.func @transform_0(%arg0: i32) -> (i32, i32) {
    %c0_i32 = arith.constant 0 : i32
    %c0_i32_0 = arith.constant 0 : i32
    return %arg0, %c0_i32 : i32, i32
  }
  func.func @transform_1(%arg0: i32) -> (i32, i32) {
    %c0_i32 = arith.constant 0 : i32
    %c0_i32_0 = arith.constant 0 : i32
    %c0_i32_1 = arith.constant 0 : i32
    return %c0_i32, %c0_i32_0 : i32, i32
  }
  func.func @transform_2(%arg0: i32) -> (i32, i32) {
    %c0_i32 = arith.constant 0 : i32
    %c0_i32_0 = arith.constant 0 : i32
    %c0_i32_1 = arith.constant 0 : i32
    return %c0_i32, %c0_i32_0 : i32, i32
  }
  func.func @transform_3(%arg0: i32) -> (i32, i32) {
    %c0_i32 = arith.constant 0 : i32
    %c0_i32_0 = arith.constant 0 : i32
    %c0_i32_1 = arith.constant 0 : i32
    return %c0_i32, %c0_i32_0 : i32, i32
  }
  func.func @transform_4(%arg0: i32) -> (i32, i32) {
    %c0_i32 = arith.constant 0 : i32
    %c0_i32_0 = arith.constant 0 : i32
    %c0_i32_1 = arith.constant 0 : i32
    return %c0_i32, %c0_i32_0 : i32, i32
  }
  func.func @transform_5(%arg0: i32) -> (i32, i32) {
    %c0_i32 = arith.constant 0 : i32
    %c0_i32_0 = arith.constant 0 : i32
    %c0_i32_1 = arith.constant 0 : i32
    return %c0_i32, %c0_i32_0 : i32, i32
  }
  func.func @transform_6(%arg0: i32) -> (i32, i32) {
    %c0_i32 = arith.constant 0 : i32
    %c0_i32_0 = arith.constant 0 : i32
    %c0_i32_1 = arith.constant 0 : i32
    return %c0_i32, %c0_i32_0 : i32, i32
  }
  func.func @transform_7(%arg0: i32) -> (i32, i32) {
    %c0_i32 = arith.constant 0 : i32
    %c0_i32_0 = arith.constant 0 : i32
    %c0_i32_1 = arith.constant 0 : i32
    return %c0_i32, %c0_i32_0 : i32, i32
  }
  func.func @transform_8(%arg0: i32) -> (i32, i32) {
    %c0_i32 = arith.constant 0 : i32
    %c0_i32_0 = arith.constant 0 : i32
    %c0_i32_1 = arith.constant 0 : i32
    return %c0_i32, %c0_i32_0 : i32, i32
  }
  func.func @transform_9(%arg0: i32) -> (i32, i32) {
    %c0_i32 = arith.constant 0 : i32
    %c0_i32_0 = arith.constant 0 : i32
    %c0_i32_1 = arith.constant 0 : i32
    return %c0_i32, %c0_i32_0 : i32, i32
  }
  func.func @transform_10(%arg0: i32) -> (i32, i32) {
    %c0_i32 = arith.constant 0 : i32
    %c0_i32_0 = arith.constant 0 : i32
    %c0_i32_1 = arith.constant 0 : i32
    return %c0_i32, %c0_i32_0 : i32, i32
  }
  func.func @transform_11(%arg0: i32) -> (i32, i32) {
    %c0_i32 = arith.constant 0 : i32
    %c0_i32_0 = arith.constant 0 : i32
    %c0_i32_1 = arith.constant 0 : i32
    return %c0_i32, %c0_i32_0 : i32, i32
  }
  func.func @transform_12(%arg0: i32) -> (i32, i32) {
    %c0_i32 = arith.constant 0 : i32
    %c0_i32_0 = arith.constant 0 : i32
    %c0_i32_1 = arith.constant 0 : i32
    return %c0_i32, %c0_i32_0 : i32, i32
  }
  func.func @transform_13(%arg0: i32) -> (i32, i32) {
    %c0_i32 = arith.constant 0 : i32
    %c0_i32_0 = arith.constant 0 : i32
    return %arg0, %c0_i32 : i32, i32
  }
}

</mosaic_0001>

<bundles_post_ra>
// kernel: tpu_custom_call.1
= control target key start
LH: loop header
LB: loop body
LE: loop exit
PB: predicated region body
PF: predicated region fallthrough
CT: control target
= control target key end

     0   :  { %s3106_s0 = inlined_call_operand.vmem [shape: f32[2,32], index: 0, kind: input, shape index: {}]   ;;  %s3107_s1 = inlined_call_operand.vmem [shape: f32[4,32], index: 1, kind: input, shape index: {}]   ;;  %s3108_s2 = inlined_call_operand.vmem [shape: f32[1,32], index: 2, kind: input, shape index: {}]   ;;  %s3109_s3 = inlined_call_operand.vmem [shape: f32[32,16], index: 3, kind: input, shape index: {}]   ;;  %s3110_s4 = inlined_call_operand.vmem [shape: f32[1,16], index: 4, kind: input, shape index: {}]   ;;  %s3111_s5 = inlined_call_operand.vmem [shape: f32[16,1], index: 5, kind: input, shape index: {}]   ;;  %s3112_s6 = inlined_call_operand.<no memory space> [shape: f32[1,1], index: 6, kind: input, shape index: {}]   ;;  %s3113_s7 = inlined_call_operand.vmem [shape: f32[8,32], index: 7, kind: input, shape index: {}]   ;;  %s3114_s8 = inlined_call_operand.vmem [shape: f32[1,32], index: 8, kind: input, shape index: {}]   ;;  %s3115_s9 = inlined_call_operand.vmem [shape: f32[32,32], index: 9, kind: input, shape index: {}]   ;;  %s3116_s10 = inlined_call_operand.vmem [shape: f32[1,32], index: 10, kind: input, shape index: {}]   ;;  %s3117_s11 = inlined_call_operand.vmem [shape: f32[32,3], index: 11, kind: input, shape index: {}]   ;;  %s3118_s12 = inlined_call_operand.vmem [shape: f32[1,3], index: 12, kind: input, shape index: {}]   ;;  %s3119_s13 = inlined_call_operand.hbm [shape: f32[2,3], index: 13, kind: output, shape index: {}]  }
   0x1   :  { %v18_v0 = vstv %s3112_s6 }
   0x2   :  { %19 = vst [vmem:[#allocation3] sm:$0x1] %v18_v0 }
   0x3   :  { %v2809_v1 = vld [vmem:[%s3107_s1] sm:$0xf]  ;;  %vm80_vm0 = vcmask 1043456   ;;  %vm76_vm1 = vcmask 31744   ;;  %v2715_v2 = vmov 0.0   ;;  %vm2716_vm2 = vmmov 0  }
   0x4   :  { %2326 = vmatprep.subr.mxu0 %v2715_v2  ;;  %2328 = vmatprep.mubr.msk.f32.mxu0 %vm2716_vm2, %v2715_v2  ;;  %v69_v3 = vld [vmem:[%s3106_s0] sm:$0x3] }
   0x5   :  { %20 = vsyncpa [#allocation5], 0  ;;  %2327 = vmatpush3.msk.msra.mxu0 %vm80_vm0, %v2809_v1  ;;  %2339 = vmatprep.mubr.msk.f32.mxu1 %vm2716_vm2, %v2715_v2  ;;  %v48_v4 = vld [vmem:[%s3109_s3] sm:$0xff]  ;;  %v49_v5 = vld [vmem:[%s3109_s3 + $0x8] sm:$0xff]  ;;  %v2717_v7 = vmov 0.0|0.0   ;;  %s2718_s22 = smov 124  }
   0x6   :  { %2329 = vmatmul.mubr.msk.f32.vlgmr.msra.gmra.mrb[0].mxu0 %vm76_vm1, %v69_v3  ;;  %v50_v6 = vld [vmem:[%s3109_s3 + $0x10] sm:$0xff]  ;;  %2537 = vmatprep.subr.bf16.mxu1 %v2717_v7  ;;  %v2834_v8 = vpack.c.bf16 %v49_v5, %v48_v4  ;;  %v51_v9 = vld [vmem:[%s3109_s3 + $0x18] sm:$0xff]  ;;  %v319_v11 = vld [vmem:[%s3106_s0] sm:$0x3]  ;;  %vm161_vm3 = vcmask 261120   ;;  %vm242_vm4 = vcmask 130048  }
   0x7   :  { %2346 = vmatprep.mubr.msk.f32.mxu0 %vm2716_vm2, %v2715_v2  ;;  %2543 = vmatprep.subr.bf16.mxu0 %v2717_v7  ;;  %v2841_v10 = vpack.c.bf16 %v51_v9, %v50_v6  ;;  %v2852_v12 = vld [vmem:[%s3108_s2] ss:$0 sm:$0xff]  ;;  %v53_v18 = vld [vmem:[%s3111_s5 + $0x8] sm:$0xff]  ;;  %s2719_s29 = smov 120   ;;  %vm317_vm5 = vcmask 1024   ;;  %s2720_s6 = smov 116  }
   0x8   :  { %2539 = vmatpush3.bf16.msra.mxu1 %v2834_v8  ;;  %321 = vrot.lane.b32.xlu0 %v319_v11, %s2718_s22  ;;  %v52_v17 = vld [vmem:[%s3111_s5] sm:$0xff]  ;;  %s2721_s16 = smov 112   ;;  %s2722_s19 = smov 104   ;;  %vm548_vm6 = vcmask 9224   ;;  %vm779_vm7 = vcmask 17424   ;;  %vm1010_vm8 = vcmask 25624  }
   0x9   :  { %2540 = vmatprep.subr.bf16.mxu1 %v2717_v7  ;;  %v2868_v19 = vpack.c.bf16 %v53_v18, %v52_v17  ;;  %v2875_v20 = vld [vmem:[%s3110_s4] ss:$0 sm:$0xff]  ;;  %v2892_v27 = vld [vmem:[#allocation3] ss:$0 sm:$0xff]  ;;  %s2723_s20 = smov 1   ;;  %s2724_s23 = smov 108  }
   0xa   :  { %v550_v26 = vld [vmem:[%s3106_s0] sm:$0x3]  ;;  %s2725_s24 = smov 100   ;;  %s2726_s25 = smov 2   ;;  %vm1241_vm9 = vcmask 33824   ;;  %vm1472_vm10 = vcmask 42024  }
   0xb   :  { %2545 = vmatpush3.bf16.msra.mxu0 %v2868_v19  ;;  %v781_v41 = vld [vmem:[%s3106_s0] sm:$0x3]  ;;  %s2728_s26 = smov 4   ;;  %s2729_s27 = smov 5   ;;  %vm1703_vm11 = vcmask 50224   ;;  %vm1934_vm12 = vcmask 58424  }
   0xc   :  { %2542 = vmatpush3.bf16.msra.mxu1 %v2841_v10  ;;  %2349 = vmatprep.subr.mxu0 %v2715_v2  ;;  %v1012_v42 = vld [vmem:[%s3106_s0] sm:$0x3]  ;;  %s2730_s28 = smov 6   ;;  %vm1943_vm13 = vcmask 64512   ;;  %vm2177_vm14 = vcmask 17408  }
   0xd   :  { %2546 = vmatprep.subr.bf16.mxu1 %v2717_v7  ;;  %552 = vrot.lane.b32.xlu0 %v550_v26, %s2719_s29  ;;  %v1474_v43 = vld [vmem:[%s3106_s0] sm:$0x3]  ;;  %s2731_s29 = smov 7  }
   0xe   :  { %783 = vrot.lane.b32.xlu1 %v781_v41, %s2720_s6  ;;  %v1243_v60 = vld [vmem:[%s3106_s0] sm:$0x3] }
   0xf   :  { %v1705_v61 = vld [vmem:[%s3106_s0] sm:$0x3]  ;;  %s2727_s0 = smov 3  }
  0x11   :  { %1245 = vrot.lane.b32.xlu0 %v1243_v60, %s2724_s23 }
  0x12   :  { %1014 = vrot.lane.b32.xlu1 %v1012_v42, %s2721_s16 }
  0x15   :  { %1707 = vrot.lane.b32.xlu0 %v1705_v61, %s2725_s24 }
  0x16   :  { %1476 = vrot.lane.b32.xlu1 %v1474_v43, %s2722_s19 }
  0x7a   :  { %v322_v25 = vpop.permute.xlu0 %321 }
  0x7f   :  { %v553_v40 = vpop.permute.xlu0 %552 }
  0x80   :  { %v784_v52 = vpop.permute.xlu1 %783 }
  0x83   :  { %v1246_v11 = vpop.permute.xlu0 %1245 }
  0x84   :  { %v1015_v53 = vpop.permute.xlu1 %1014 }
  0x88   :  { %v2933_v54 = vpop.permute.xlu1 %1476 }
  0xd9   :  { %v150_v13 = vpop.f32.mrb[0].mxu0 }
  0xda   :  { %v151_v14 = vadd.f32 %v2852_v12, %v150_v13  ;;  %v2330_v15 = vpop.f32.mrb[1].mxu0  ;;  %v2962_v13 = vpop.permute.xlu0 %1707 }
  0xdc   :  { %2639 = vtanh.f32 %v151_v14 }
  0xe6   :  { %v2640_v16 = vpop.eup %2639 }
  0xe7   :  { %2340 = vmatmul.mubr.msk.f32.vlgmr.msra.gmra.mrb[0].mxu1 %vm161_vm3, %v2640_v16 }
  0xe8   :  { %2548 = vmatpush3.bf16.msra.mxu1 %v2834_v8  ;;  %2362 = vmatprep.mubr.msk.f32.mxu1 %vm2716_vm2, %v2715_v2 }
  0xe9   :  { %2549 = vmatprep.subr.bf16.mxu1 %v2717_v7 }
  0xec   :  { %2551 = vmatpush3.bf16.msra.mxu1 %v2841_v10 }
  0xed   :  { %2555 = vmatprep.subr.bf16.mxu1 %v2717_v7 }
 0x1ba   :  { %v231_v21 = vpop.f32.mrb[0].mxu1 }
 0x1bb   :  { %v232_v22 = vadd.f32 %v2875_v20, %v231_v21  ;;  %v2341_v23 = vpop.f32.mrb[1].mxu1 }
 0x1bd   :  { %2641 = vtanh.f32 %v232_v22 }
 0x1c7   :  { %v2642_v24 = vpop.eup %2641 }
 0x1c8   :  { %2347 = vmatmul.mubr.msk.f32.vlgmr.msra.gmra.mrb[2].mxu0 %vm242_vm4, %v2642_v24 }
 0x1c9   :  { %2350 = vmatpush3.msk.msra.mxu0 %vm80_vm0, %v2809_v1  ;;  %2351 = vmatprep.mubr.msk.f32.mxu0 %vm2716_vm2, %v2715_v2 }
 0x1ca   :  { %2552 = vmatprep.subr.bf16.mxu0 %v2717_v7 }
 0x1cc   :  { %2352 = vmatmul.mubr.msk.f32.vlgmr.msra.gmra.mrb[4].mxu0 %vm76_vm1, %v322_v25 }
 0x1cd   :  { %2554 = vmatpush3.bf16.msra.mxu0 %v2868_v19  ;;  %2369 = vmatprep.mubr.msk.f32.mxu0 %vm2716_vm2, %v2715_v2 }
 0x1ce   :  { %2372 = vmatprep.subr.mxu0 %v2715_v2 }
 0x29b   :  { %v312_v28 = vpop.f32.mrb[2].mxu0 }
 0x29c   :  { %v313_v29 = vadd.f32 %v2892_v27, %v312_v28  ;;  %v2348_v30 = vpop.f32.mrb[3].mxu0 }
 0x29e   :  { %2643 = vtanh.f32 %v313_v29 }
 0x29f   :  { %v391_v31 = vpop.f32.mrb[4].mxu0 }
 0x2a0   :  { %v392_v32 = vadd.f32 %v2852_v12, %v391_v31  ;;  %v2353_v33 = vpop.f32.mrb[5].mxu0 }
 0x2a2   :  { %2645 = vtanh.f32 %v392_v32 }
 0x2a8   :  { %v2644_v34 = vpop.eup %2643 }
 0x2a9   :  { %318 = vst.msk [vmem:[#allocation2] sm:$0x3] %vm317_vm5, %v2644_v34 }
 0x2ac   :  { %v2646_v35 = vpop.eup %2645 }
 0x2ad   :  { %2363 = vmatmul.mubr.msk.f32.vlgmr.msra.gmra.mrb[2].mxu1 %vm161_vm3, %v2646_v35 }
 0x2ae   :  { %2557 = vmatpush3.bf16.msra.mxu1 %v2834_v8  ;;  %2385 = vmatprep.mubr.msk.f32.mxu1 %vm2716_vm2, %v2715_v2 }
 0x2af   :  { %2558 = vmatprep.subr.bf16.mxu1 %v2717_v7 }
 0x2b2   :  { %2560 = vmatpush3.bf16.msra.mxu1 %v2841_v10 }
 0x2b3   :  { %2564 = vmatprep.subr.bf16.mxu1 %v2717_v7 }
 0x380   :  { %v465_v36 = vpop.f32.mrb[2].mxu1 }
 0x381   :  { %v466_v37 = vadd.f32 %v2875_v20, %v465_v36  ;;  %v2364_v38 = vpop.f32.mrb[3].mxu1 }
 0x383   :  { %2647 = vtanh.f32 %v466_v37 }
 0x38d   :  { %v2648_v39 = vpop.eup %2647 }
 0x38e   :  { %2370 = vmatmul.mubr.msk.f32.vlgmr.msra.gmra.mrb[6].mxu0 %vm242_vm4, %v2648_v39 }
 0x38f   :  { %2373 = vmatpush3.msk.msra.mxu0 %vm80_vm0, %v2809_v1  ;;  %2374 = vmatprep.mubr.msk.f32.mxu0 %vm2716_vm2, %v2715_v2 }
 0x390   :  { %2561 = vmatprep.subr.bf16.mxu0 %v2717_v7 }
 0x392   :  { %2375 = vmatmul.mubr.msk.f32.vlgmr.msra.gmra.mrb[8].mxu0 %vm76_vm1, %v553_v40 }
 0x393   :  { %2563 = vmatpush3.bf16.msra.mxu0 %v2868_v19  ;;  %2392 = vmatprep.mubr.msk.f32.mxu0 %vm2716_vm2, %v2715_v2 }
 0x394   :  { %2395 = vmatprep.subr.mxu0 %v2715_v2 }
 0x461   :  { %v539_v44 = vpop.f32.mrb[6].mxu0 }
 0x462   :  { %v540_v45 = vadd.f32 %v2892_v27, %v539_v44  ;;  %v2371_v46 = vpop.f32.mrb[7].mxu0 }
 0x464   :  { %2649 = vtanh.f32 %v540_v45 }
 0x465   :  { %v622_v47 = vpop.f32.mrb[8].mxu0 }
 0x466   :  { %v623_v48 = vadd.f32 %v2852_v12, %v622_v47  ;;  %v2376_v49 = vpop.f32.mrb[9].mxu0 }
 0x468   :  { %2651 = vtanh.f32 %v623_v48 }
 0x46e   :  { %v2650_v50 = vpop.eup %2649 }
 0x46f   :  { %545 = vrot.lane.b32.xlu1 %v2650_v50, %s2723_s20 }
 0x472   :  { %v2652_v51 = vpop.eup %2651 }
 0x473   :  { %2386 = vmatmul.mubr.msk.f32.vlgmr.msra.gmra.mrb[4].mxu1 %vm161_vm3, %v2652_v51 }
 0x474   :  { %2566 = vmatpush3.bf16.msra.mxu1 %v2834_v8  ;;  %2408 = vmatprep.mubr.msk.f32.mxu1 %vm2716_vm2, %v2715_v2 }
 0x475   :  { %2567 = vmatprep.subr.bf16.mxu1 %v2717_v7 }
 0x478   :  { %2569 = vmatpush3.bf16.msra.mxu1 %v2841_v10 }
 0x479   :  { %2573 = vmatprep.subr.bf16.mxu1 %v2717_v7 }
 0x4e1   :  { %v546_v55 = vpop.permute.xlu1 %545 }
 0x4e2   :  { %549 = vst.msk [vmem:[#allocation2] sm:$0x3] %vm548_vm6, %v546_v55 }
 0x546   :  { %v696_v56 = vpop.f32.mrb[4].mxu1 }
 0x547   :  { %v697_v57 = vadd.f32 %v2875_v20, %v696_v56  ;;  %v2387_v58 = vpop.f32.mrb[5].mxu1 }
 0x549   :  { %2653 = vtanh.f32 %v697_v57 }
 0x553   :  { %v2654_v59 = vpop.eup %2653 }
 0x554   :  { %2393 = vmatmul.mubr.msk.f32.vlgmr.msra.gmra.mrb[10].mxu0 %vm242_vm4, %v2654_v59 }
 0x555   :  { %2396 = vmatpush3.msk.msra.mxu0 %vm80_vm0, %v2809_v1  ;;  %2397 = vmatprep.mubr.msk.f32.mxu0 %vm2716_vm2, %v2715_v2 }
 0x556   :  { %2570 = vmatprep.subr.bf16.mxu0 %v2717_v7 }
 0x558   :  { %2398 = vmatmul.mubr.msk.f32.vlgmr.msra.gmra.mrb[12].mxu0 %vm76_vm1, %v784_v52 }
 0x559   :  { %2572 = vmatpush3.bf16.msra.mxu0 %v2868_v19  ;;  %2415 = vmatprep.mubr.msk.f32.mxu0 %vm2716_vm2, %v2715_v2 }
 0x55a   :  { %2418 = vmatprep.subr.mxu0 %v2715_v2 }
 0x627   :  { %v770_v62 = vpop.f32.mrb[10].mxu0 }
 0x628   :  { %v771_v63 = vadd.f32 %v2892_v27, %v770_v62  ;;  %v2394_v0 = vpop.f32.mrb[11].mxu0 }
 0x62a   :  { %2655 = vtanh.f32 %v771_v63 }
 0x62b   :  { %v853_v3 = vpop.f32.mrb[12].mxu0 }
 0x62c   :  { %v854_v4 = vadd.f32 %v2852_v12, %v853_v3  ;;  %v2399_v5 = vpop.f32.mrb[13].mxu0 }
 0x62e   :  { %2657 = vtanh.f32 %v854_v4 }
 0x634   :  { %v2656_v6 = vpop.eup %2655 }
 0x635   :  { %776 = vrot.lane.b32.xlu0 %v2656_v6, %s2726_s25 }
 0x638   :  { %v2658_v9 = vpop.eup %2657 }
 0x639   :  { %2409 = vmatmul.mubr.msk.f32.vlgmr.msra.gmra.mrb[6].mxu1 %vm161_vm3, %v2658_v9 }
 0x63a   :  { %2575 = vmatpush3.bf16.msra.mxu1 %v2834_v8  ;;  %2431 = vmatprep.mubr.msk.f32.mxu1 %vm2716_vm2, %v2715_v2 }
 0x63b   :  { %2576 = vmatprep.subr.bf16.mxu1 %v2717_v7 }
 0x63e   :  { %2578 = vmatpush3.bf16.msra.mxu1 %v2841_v10 }
 0x63f   :  { %2582 = vmatprep.subr.bf16.mxu1 %v2717_v7 }
 0x6a7   :  { %v777_v14 = vpop.permute.xlu0 %776 }
 0x6a8   :  { %780 = vst.msk [vmem:[#allocation2] sm:$0x3] %vm779_vm7, %v777_v14  ;;  %v54_v14 = vld [vmem:[%s3113_s7] sm:$0xff] }
 0x70c   :  { %v927_v15 = vpop.f32.mrb[6].mxu1 }
 0x70d   :  { %v928_v16 = vadd.f32 %v2875_v20, %v927_v15  ;;  %v2410_v17 = vpop.f32.mrb[7].mxu1 }
 0x70e   :  { %v56_v17 = vld [vmem:[%s3115_s9 + $0x8] sm:$0xff] }
 0x70f   :  { %2659 = vtanh.f32 %v928_v16 }
 0x719   :  { %v2660_v18 = vpop.eup %2659 }
 0x71a   :  { %2416 = vmatmul.mubr.msk.f32.vlgmr.msra.gmra.mrb[14].mxu0 %vm242_vm4, %v2660_v18  ;;  %v57_v18 = vld [vmem:[%s3115_s9 + $0x10] sm:$0xff] }
 0x71b   :  { %2419 = vmatpush3.msk.msra.mxu0 %vm80_vm0, %v2809_v1  ;;  %2420 = vmatprep.mubr.msk.f32.mxu0 %vm2716_vm2, %v2715_v2 }
 0x71c   :  { %2579 = vmatprep.subr.bf16.mxu0 %v2717_v7 }
 0x71e   :  { %2421 = vmatmul.mubr.msk.f32.vlgmr.msra.gmra.mrb[16].mxu0 %vm76_vm1, %v1015_v53 }
 0x71f   :  { %2581 = vmatpush3.bf16.msra.mxu0 %v2868_v19  ;;  %2438 = vmatprep.mubr.msk.f32.mxu0 %vm2716_vm2, %v2715_v2 }
 0x720   :  { %2441 = vmatprep.subr.mxu0 %v2715_v2 }
 0x7ed   :  { %v1001_v21 = vpop.f32.mrb[14].mxu0 }
 0x7ee   :  { %v1002_v22 = vadd.f32 %v2892_v27, %v1001_v21  ;;  %v2417_v23 = vpop.f32.mrb[15].mxu0 }
 0x7f0   :  { %2661 = vtanh.f32 %v1002_v22  ;;  %v58_v22 = vld [vmem:[%s3115_s9 + $0x18] sm:$0xff] }
 0x7f1   :  { %v1084_v24 = vpop.f32.mrb[16].mxu0  ;;  %v2613_v23 = vpack.c.bf16 %v58_v22, %v57_v18 }
 0x7f2   :  { %v1085_v25 = vadd.f32 %v2852_v12, %v1084_v24  ;;  %v2422_v26 = vpop.f32.mrb[17].mxu0 }
 0x7f4   :  { %2663 = vtanh.f32 %v1085_v25 }
 0x7fa   :  { %v2662_v28 = vpop.eup %2661 }
 0x7fb   :  { %1007 = vrot.lane.b32.xlu1 %v2662_v28, %s2727_s0 }
 0x7fe   :  { %v2664_v29 = vpop.eup %2663 }
 0x7ff   :  { %2432 = vmatmul.mubr.msk.f32.vlgmr.msra.gmra.mrb[8].mxu1 %vm161_vm3, %v2664_v29  ;;  %v59_v29 = vld [vmem:[%s3117_s11] sm:$0xff] }
 0x800   :  { %2584 = vmatpush3.bf16.msra.mxu1 %v2834_v8  ;;  %2454 = vmatprep.mubr.msk.f32.mxu1 %vm2716_vm2, %v2715_v2 }
 0x801   :  { %2585 = vmatprep.subr.bf16.mxu1 %v2717_v7 }
 0x804   :  { %2587 = vmatpush3.bf16.msra.mxu1 %v2841_v10 }
 0x805   :  { %2591 = vmatprep.subr.bf16.mxu1 %v2717_v7 }
 0x86d   :  { %v1008_v30 = vpop.permute.xlu1 %1007 }
 0x86e   :  { %1011 = vst.msk [vmem:[#allocation2] sm:$0x3] %vm1010_vm8, %v1008_v30  ;;  %v60_v30 = vld [vmem:[%s3117_s11 + $0x8] sm:$0xff] }
 0x8d2   :  { %v1158_v31 = vpop.f32.mrb[8].mxu1 }
 0x8d3   :  { %v1159_v32 = vadd.f32 %v2875_v20, %v1158_v31  ;;  %v2433_v33 = vpop.f32.mrb[9].mxu1  ;;  %v61_v31 = vld [vmem:[%s3117_s11 + $0x10] sm:$0xff] }
 0x8d4   :  { %v62_v33 = vld [vmem:[%s3117_s11 + $0x18] sm:$0xff]  ;;  %s2732_s11 = smov [#allocation4]  }
 0x8d5   :  { %2665 = vtanh.f32 %v1159_v32  ;;  %v2616_v32 = vpack.c.bf16 %v60_v30, %v59_v29 }
 0x8df   :  { %v2666_v34 = vpop.eup %2665 }
 0x8e0   :  { %2439 = vmatmul.mubr.msk.f32.vlgmr.msra.gmra.mrb[18].mxu0 %vm242_vm4, %v2666_v34  ;;  %v2619_v34 = vpack.c.bf16 %v62_v33, %v61_v31 }
 0x8e1   :  { %2442 = vmatpush3.msk.msra.mxu0 %vm80_vm0, %v2809_v1  ;;  %2443 = vmatprep.mubr.msk.f32.mxu0 %vm2716_vm2, %v2715_v2 }
 0x8e2   :  { %2588 = vmatprep.subr.bf16.mxu0 %v2717_v7 }
 0x8e4   :  { %2444 = vmatmul.mubr.msk.f32.vlgmr.msra.gmra.mrb[20].mxu0 %vm76_vm1, %v1246_v11 }
 0x8e5   :  { %2590 = vmatpush3.bf16.msra.mxu0 %v2868_v19  ;;  %2461 = vmatprep.mubr.msk.f32.mxu0 %vm2716_vm2, %v2715_v2 }
 0x8e6   :  { %2464 = vmatprep.subr.mxu0 %v2715_v2 }
 0x9b3   :  { %v1232_v35 = vpop.f32.mrb[18].mxu0 }
 0x9b4   :  { %v1233_v36 = vadd.f32 %v2892_v27, %v1232_v35  ;;  %v2440_v37 = vpop.f32.mrb[19].mxu0  ;;  %v2230_v35 = vld [vmem:[%s3116_s10] ss:$0 sm:$0xff] }
 0x9b6   :  { %2667 = vtanh.f32 %v1233_v36 }
 0x9b7   :  { %v1315_v38 = vpop.f32.mrb[20].mxu0 }
 0x9b8   :  { %v1316_v39 = vadd.f32 %v2852_v12, %v1315_v38  ;;  %v2445_v40 = vpop.f32.mrb[21].mxu0 }
 0x9b9   :  { %v2232_v40 = vld [vmem:[%s3118_s12] ss:$0 sm:$0xff] }
 0x9ba   :  { %2669 = vtanh.f32 %v1316_v39 }
 0x9c0   :  { %v2668_v41 = vpop.eup %2667 }
 0x9c1   :  { %1238 = vrot.lane.b32.xlu0 %v2668_v41, %s2728_s26 }
 0x9c4   :  { %v2670_v42 = vpop.eup %2669 }
 0x9c5   :  { %2455 = vmatmul.mubr.msk.f32.vlgmr.msra.gmra.mrb[10].mxu1 %vm161_vm3, %v2670_v42 }
 0x9c6   :  { %2593 = vmatpush3.bf16.msra.mxu1 %v2834_v8  ;;  %2477 = vmatprep.mubr.msk.f32.mxu1 %vm2716_vm2, %v2715_v2 }
 0x9c7   :  { %2594 = vmatprep.subr.bf16.mxu1 %v2717_v7 }
 0x9ca   :  { %2596 = vmatpush3.bf16.msra.mxu1 %v2841_v10 }
 0x9cb   :  { %2600 = vmatprep.subr.bf16.mxu1 %v2717_v7 }
 0xa33   :  { %v1239_v43 = vpop.permute.xlu0 %1238 }
 0xa34   :  { %1242 = vst.msk [vmem:[#allocation2] sm:$0x3] %vm1241_vm9, %v1239_v43 }
 0xa98   :  { %v1389_v44 = vpop.f32.mrb[10].mxu1 }
 0xa99   :  { %v1390_v45 = vadd.f32 %v2875_v20, %v1389_v44  ;;  %v2456_v46 = vpop.f32.mrb[11].mxu1 }
 0xa9b   :  { %2671 = vtanh.f32 %v1390_v45 }
 0xaa5   :  { %v2672_v47 = vpop.eup %2671 }
 0xaa6   :  { %2462 = vmatmul.mubr.msk.f32.vlgmr.msra.gmra.mrb[22].mxu0 %vm242_vm4, %v2672_v47 }
 0xaa7   :  { %2465 = vmatpush3.msk.msra.mxu0 %vm80_vm0, %v2809_v1  ;;  %2466 = vmatprep.mubr.msk.f32.mxu0 %vm2716_vm2, %v2715_v2 }
 0xaa8   :  { %2597 = vmatprep.subr.bf16.mxu0 %v2717_v7 }
 0xaaa   :  { %2467 = vmatmul.mubr.msk.f32.vlgmr.msra.gmra.mrb[24].mxu0 %vm76_vm1, %v2933_v54 }
 0xaab   :  { %2599 = vmatpush3.bf16.msra.mxu0 %v2868_v19  ;;  %2484 = vmatprep.mubr.msk.f32.mxu0 %vm2716_vm2, %v2715_v2 }
 0xaac   :  { %2487 = vmatprep.subr.mxu0 %v2715_v2 }
 0xb79   :  { %v1463_v48 = vpop.f32.mrb[22].mxu0 }
 0xb7a   :  { %v1464_v49 = vadd.f32 %v2892_v27, %v1463_v48  ;;  %v2463_v50 = vpop.f32.mrb[23].mxu0 }
 0xb7c   :  { %2673 = vtanh.f32 %v1464_v49 }
 0xb7d   :  { %v1546_v51 = vpop.f32.mrb[24].mxu0 }
 0xb7e   :  { %v1547_v52 = vadd.f32 %v2852_v12, %v1546_v51  ;;  %v2468_v53 = vpop.f32.mrb[25].mxu0 }
 0xb80   :  { %2675 = vtanh.f32 %v1547_v52 }
 0xb86   :  { %v2674_v55 = vpop.eup %2673 }
 0xb87   :  { %1469 = vrot.lane.b32.xlu1 %v2674_v55, %s2729_s27  ;;  %s2185_s27 = sshll.u32 %s2732_s11, 4  ;;  %s2186_s27 = int_to_ptr.vmem [resolvable:$true] %s2185_s27 }
 0xb88   :  { %s2691_s10 = scalar_lea.vmem %s2186_s27, 32  ;;  %p2696_p1 = scmp.lt.s32.totalorder %s2186_s27, %s2186_s27 }
 0xb89   :  { %p2692_p0 = scmp.ne.s32.totalorder %s2186_s27, %s2691_s10  ;;  %p2697_p2 = scmp.lt.s32.totalorder %s2691_s10, %s2691_s10 }
 0xb8a   :  { %v2676_v54 = vpop.eup %2675 }
 0xb8b   :  { %2478 = vmatmul.mubr.msk.f32.vlgmr.msra.gmra.mrb[12].mxu1 %vm161_vm3, %v2676_v54  ;;  %p2698_p3 = por %p2697_p2, %p2696_p1 }
 0xb8c   :  { %2602 = vmatpush3.bf16.msra.mxu1 %v2834_v8  ;;  %2500 = vmatprep.mubr.msk.f32.mxu1 %vm2716_vm2, %v2715_v2 }
 0xb8d   :  { %2603 = vmatprep.subr.bf16.mxu1 %v2717_v7  ;;  %p2699_p4 = pnand %p2698_p3, %p2692_p0 }
 0xb90   :  { %2605 = vmatpush3.bf16.msra.mxu1 %v2841_v10 }
 0xb91   :  { %2609 = vmatprep.subr.bf16.mxu1 %v2717_v7 }
 0xbf9   :  { %v1470_v56 = vpop.permute.xlu1 %1469 }
 0xbfa   :  { %1473 = vst.msk [vmem:[#allocation2] sm:$0x3] %vm1472_vm10, %v1470_v56 }
 0xc5e   :  { %v1620_v57 = vpop.f32.mrb[12].mxu1 }
 0xc5f   :  { %v1621_v58 = vadd.f32 %v2875_v20, %v1620_v57  ;;  %v2479_v59 = vpop.f32.mrb[13].mxu1 }
 0xc61   :  { %2677 = vtanh.f32 %v1621_v58 }
 0xc6b   :  { %v2678_v60 = vpop.eup %2677 }
 0xc6c   :  { %2485 = vmatmul.mubr.msk.f32.vlgmr.msra.gmra.mrb[26].mxu0 %vm242_vm4, %v2678_v60 }
 0xc6d   :  { %2488 = vmatpush3.msk.msra.mxu0 %vm80_vm0, %v2809_v1  ;;  %2489 = vmatprep.mubr.msk.f32.mxu0 %vm2716_vm2, %v2715_v2 }
 0xc6e   :  { %2606 = vmatprep.subr.bf16.mxu0 %v2717_v7 }
 0xc70   :  { %2490 = vmatmul.mubr.msk.f32.vlgmr.msra.gmra.mrb[28].mxu0 %vm76_vm1, %v2962_v13 }
 0xc71   :  { %2608 = vmatpush3.bf16.msra.mxu0 %v2868_v19  ;;  %2507 = vmatprep.mubr.msk.f32.mxu0 %vm2716_vm2, %v2715_v2 }
 0xc72   :  { %2510 = vmatprep.subr.mxu0 %v2715_v2 }
 0xd3f   :  { %v1694_v8 = vpop.f32.mrb[26].mxu0 }
 0xd40   :  { %v1695_v10 = vadd.f32 %v2892_v27, %v1694_v8  ;;  %v2486_v61 = vpop.f32.mrb[27].mxu0 }
 0xd42   :  { %2679 = vtanh.f32 %v1695_v10 }
 0xd43   :  { %v1777_v1 = vpop.f32.mrb[28].mxu0 }
 0xd44   :  { %v1778_v62 = vadd.f32 %v2852_v12, %v1777_v1  ;;  %v2491_v63 = vpop.f32.mrb[29].mxu0 }
 0xd46   :  { %2681 = vtanh.f32 %v1778_v62 }
 0xd4c   :  { %v2680_v0 = vpop.eup %2679 }
 0xd4d   :  { %1700 = vrot.lane.b32.xlu0 %v2680_v0, %s2730_s28 }
 0xd50   :  { %v2682_v3 = vpop.eup %2681 }
 0xd51   :  { %2501 = vmatmul.mubr.msk.f32.vlgmr.msra.gmra.mrb[14].mxu1 %vm161_vm3, %v2682_v3 }
 0xd52   :  { %2523 = vmatprep.mubr.msk.f32.mxu1 %vm2716_vm2, %v2715_v2 }
 0xdbf   :  { %v1701_v19 = vpop.permute.xlu0 %1700 }
 0xdc0   :  { %1704 = vst.msk [vmem:[#allocation2] sm:$0x3] %vm1703_vm11, %v1701_v19 }
 0xe24   :  { %v1851_v4 = vpop.f32.mrb[14].mxu1 }
 0xe25   :  { %v1852_v5 = vadd.f32 %v2875_v20, %v1851_v4  ;;  %v2502_v6 = vpop.f32.mrb[15].mxu1 }
 0xe27   :  { %2683 = vtanh.f32 %v1852_v5 }
 0xe31   :  { %v2684_v12 = vpop.eup %2683 }
 0xe32   :  { %2508 = vmatmul.mubr.msk.f32.vlgmr.msra.gmra.mrb[30].mxu0 %vm242_vm4, %v2684_v12 }
 0xe33   :  { %2512 = vmatprep.mubr.msk.f32.mxu0 %vm2716_vm2, %v2715_v2  ;;  %2511 = vmatpush3.msra.mxu0 %v54_v14 }
 0xe34   :  { %2615 = vmatprep.subr.bf16.mxu0 %v2717_v7 }
 0xf05   :  { %v1925_v9 = vpop.f32.mrb[30].mxu0 }
 0xf06   :  { %v1926_v11 = vadd.f32 %v2892_v27, %v1925_v9  ;;  %v2509_v13 = vpop.f32.mrb[31].mxu0  ;;  %v55_v27 = vld [vmem:[%s3115_s9] sm:$0xff] }
 0xf07   :  { %v2610_v21 = vpack.c.bf16 %v56_v17, %v55_v27 }
 0xf08   :  { %2685 = vtanh.f32 %v1926_v11 }
 0xf09   :  { %2611 = vmatpush3.bf16.msra.mxu1 %v2610_v21 }
 0xf0a   :  { %2612 = vmatprep.subr.bf16.mxu1 %v2717_v7 }
 0xf0d   :  { %2614 = vmatpush3.bf16.msra.mxu1 %v2613_v23 }
 0xf12   :  { %v2686_v20 = vpop.eup %2685 }
 0xf13   :  { %1931 = vrot.lane.b32.xlu1 %v2686_v20, %s2731_s29 }
 0xf85   :  { %v1932_v15 = vpop.permute.xlu1 %1931 }
 0xf86   :  { %1935 = vst.msk [vmem:[#allocation2] sm:$0x3] %vm1934_vm12, %v1932_v15 }
 0xf8d   :  { %v1936_v16 = vld [vmem:[#allocation2] sm:$0x3] }
 0xf8e   :  { %2513 = vmatmul.mubr.msk.f32.vlgmr.msra.gmra.mrb[32].mxu0 %vm1943_vm13, %v1936_v16 }
 0xf8f   :  { %2534 = vmatprep.mubr.msk.f32.mxu0 %vm2716_vm2, %v2715_v2  ;;  %v2228_v2 = vld [vmem:[%s3114_s8] ss:$0 sm:$0xff]  ;;  %2617 = vmatpush3.bf16.msra.mxu0 %v2616_v32 }
 0xf90   :  { %2618 = vmatprep.subr.bf16.mxu0 %v2717_v7 }
 0xf93   :  { %2620 = vmatpush3.bf16.msra.mxu0 %v2619_v34 }
0x1061   :  { %v2013_v24 = vpop.f32.mrb[32].mxu0 }
0x1062   :  { %v2014_v25 = vadd.f32 %v2228_v2, %v2013_v24  ;;  %v2514_v26 = vpop.f32.mrb[33].mxu0 }
0x1064   :  { %2687 = vtanh.f32 %v2014_v25 }
0x106e   :  { %v2688_v28 = vpop.eup %2687 }
0x106f   :  { %2524 = vmatmul.mubr.msk.f32.vlgmr.msra.gmra.mrb[16].mxu1 %vm161_vm3, %v2688_v28 }
0x1142   :  { %v2093_v36 = vpop.f32.mrb[16].mxu1 }
0x1143   :  { %v2094_v37 = vadd.f32 %v2230_v35, %v2093_v36  ;;  %v2525_v38 = vpop.f32.mrb[17].mxu1 }
0x1145   :  { %2689 = vtanh.f32 %v2094_v37 }
0x114f   :  { %v2690_v39 = vpop.eup %2689 }
0x1150   :  { %2535 = vmatmul.mubr.msk.f32.vlgmr.msra.gmra.mrb[34].mxu0 %vm161_vm3, %v2690_v39 }
0x1223   :  { %v2173_v41 = vpop.f32.mrb[34].mxu0 }
0x1224   :  { %v2174_v7 = vadd.f32 %v2232_v40, %v2173_v41  ;;  %v2536_v42 = vpop.f32.mrb[35].mxu0 }
0x1226   :  { %2178 = vst.msk [vmem:[#allocation4] sm:$0x3] %vm2177_vm14, %v2174_v7 }
0x1227   :  { %2702 = shalt.err (!%p2699_p4)
}
0x1228   :  { %s2703_s5 = scalar_lea.hbm %s3119_s13, 32 }
0x1229   :  { %p2704_p5 = scmp.ne.s32.totalorder %s3119_s13, %s2703_s5  ;;  %p2707_p6 = scmp.lt.u32.totalorder %s2703_s5, %s3119_s13 }
0x122b   :  { %p2709_p7 = pnand %p2707_p6, %p2704_p5 }
0x122d   :  { %2712 = shalt.err (!%p2709_p7)
}
0x122e   :  { %2188 = dma.vmem_to_hbm [thread:$0]  %s2186_s27, 32, %s3119_s13, [#allocation5]  }
0x122f   :  { %2713 = dma.done.wait [#allocation5], 32  }
0x1230   :  { %2714 = vsyncadd [#allocation5], 4294967264 }
0x1231   :  { %2192 = vsyncpa [#allocation5], 1 }

// kernel: tpu_custom_call.1
= control target key start
LH: loop header
LB: loop body
LE: loop exit
PB: predicated region body
PF: predicated region fallthrough
CT: control target
= control target key end

     0   :  { %s3106_s0 = inlined_call_operand.vmem [shape: f32[2,32], index: 0, kind: input, shape index: {}]   ;;  %s3107_s1 = inlined_call_operand.vmem [shape: f32[4,32], index: 1, kind: input, shape index: {}]   ;;  %s3108_s2 = inlined_call_operand.vmem [shape: f32[1,32], index: 2, kind: input, shape index: {}]   ;;  %s3109_s3 = inlined_call_operand.vmem [shape: f32[32,16], index: 3, kind: input, shape index: {}]   ;;  %s3110_s4 = inlined_call_operand.vmem [shape: f32[1,16], index: 4, kind: input, shape index: {}]   ;;  %s3111_s5 = inlined_call_operand.vmem [shape: f32[16,1], index: 5, kind: input, shape index: {}]   ;;  %s3112_s6 = inlined_call_operand.<no memory space> [shape: f32[1,1], index: 6, kind: input, shape index: {}]   ;;  %s3113_s7 = inlined_call_operand.vmem [shape: f32[8,32], index: 7, kind: input, shape index: {}]   ;;  %s3114_s8 = inlined_call_operand.vmem [shape: f32[1,32], index: 8, kind: input, shape index: {}]   ;;  %s3115_s9 = inlined_call_operand.vmem [shape: f32[32,32], index: 9, kind: input, shape index: {}]   ;;  %s3116_s10 = inlined_call_operand.vmem [shape: f32[1,32], index: 10, kind: input, shape index: {}]   ;;  %s3117_s11 = inlined_call_operand.vmem [shape: f32[32,3], index: 11, kind: input, shape index: {}]   ;;  %s3118_s12 = inlined_call_operand.vmem [shape: f32[1,3], index: 12, kind: input, shape index: {}]   ;;  %s3119_s13 = inlined_call_operand.hbm [shape: f32[2,3], index: 13, kind: output, shape index: {}]  }
   0x1   :  { %v18_v0 = vstv %s3112_s6 }
   0x2   :  { %19 = vst [vmem:[#allocation3] sm:$0x1] %v18_v0 }
   0x3   :  { %v2809_v1 = vld [vmem:[%s3107_s1] sm:$0xf]  ;;  %vm80_vm0 = vcmask 1043456   ;;  %vm76_vm1 = vcmask 31744   ;;  %v2715_v2 = vmov 0.0   ;;  %vm2716_vm2 = vmmov 0  }
   0x4   :  { %2326 = vmatprep.subr.mxu0 %v2715_v2  ;;  %2328 = vmatprep.mubr.msk.f32.mxu0 %vm2716_vm2, %v2715_v2  ;;  %v69_v3 = vld [vmem:[%s3106_s0] sm:$0x3] }
   0x5   :  { %20 = vsyncpa [#allocation5], 0  ;;  %2327 = vmatpush3.msk.msra.mxu0 %vm80_vm0, %v2809_v1  ;;  %2339 = vmatprep.mubr.msk.f32.mxu1 %vm2716_vm2, %v2715_v2  ;;  %v48_v4 = vld [vmem:[%s3109_s3] sm:$0xff]  ;;  %v49_v5 = vld [vmem:[%s3109_s3 + $0x8] sm:$0xff]  ;;  %v2717_v7 = vmov 0.0|0.0   ;;  %s2718_s22 = smov 124  }
   0x6   :  { %2329 = vmatmul.mubr.msk.f32.vlgmr.msra.gmra.mrb[0].mxu0 %vm76_vm1, %v69_v3  ;;  %v50_v6 = vld [vmem:[%s3109_s3 + $0x10] sm:$0xff]  ;;  %2537 = vmatprep.subr.bf16.mxu1 %v2717_v7  ;;  %v2834_v8 = vpack.c.bf16 %v49_v5, %v48_v4  ;;  %v51_v9 = vld [vmem:[%s3109_s3 + $0x18] sm:$0xff]  ;;  %v319_v11 = vld [vmem:[%s3106_s0] sm:$0x3]  ;;  %vm161_vm3 = vcmask 261120   ;;  %vm242_vm4 = vcmask 130048  }
   0x7   :  { %2346 = vmatprep.mubr.msk.f32.mxu0 %vm2716_vm2, %v2715_v2  ;;  %2543 = vmatprep.subr.bf16.mxu0 %v2717_v7  ;;  %v2841_v10 = vpack.c.bf16 %v51_v9, %v50_v6  ;;  %v2852_v12 = vld [vmem:[%s3108_s2] ss:$0 sm:$0xff]  ;;  %v53_v18 = vld [vmem:[%s3111_s5 + $0x8] sm:$0xff]  ;;  %s2719_s29 = smov 120   ;;  %vm317_vm5 = vcmask 1024   ;;  %s2720_s6 = smov 116  }
   0x8   :  { %2539 = vmatpush3.bf16.msra.mxu1 %v2834_v8  ;;  %321 = vrot.lane.b32.xlu0 %v319_v11, %s2718_s22  ;;  %v52_v17 = vld [vmem:[%s3111_s5] sm:$0xff]  ;;  %s2721_s16 = smov 112   ;;  %s2722_s19 = smov 104   ;;  %vm548_vm6 = vcmask 9224   ;;  %vm779_vm7 = vcmask 17424   ;;  %vm1010_vm8 = vcmask 25624  }
   0x9   :  { %2540 = vmatprep.subr.bf16.mxu1 %v2717_v7  ;;  %v2868_v19 = vpack.c.bf16 %v53_v18, %v52_v17  ;;  %v2875_v20 = vld [vmem:[%s3110_s4] ss:$0 sm:$0xff]  ;;  %v2892_v27 = vld [vmem:[#allocation3] ss:$0 sm:$0xff]  ;;  %s2723_s20 = smov 1   ;;  %s2724_s23 = smov 108  }
   0xa   :  { %v550_v26 = vld [vmem:[%s3106_s0] sm:$0x3]  ;;  %s2725_s24 = smov 100   ;;  %s2726_s25 = smov 2   ;;  %vm1241_vm9 = vcmask 33824   ;;  %vm1472_vm10 = vcmask 42024  }
   0xb   :  { %2545 = vmatpush3.bf16.msra.mxu0 %v2868_v19  ;;  %v781_v41 = vld [vmem:[%s3106_s0] sm:$0x3]  ;;  %s2728_s26 = smov 4   ;;  %s2729_s27 = smov 5   ;;  %vm1703_vm11 = vcmask 50224   ;;  %vm1934_vm12 = vcmask 58424  }
   0xc   :  { %2542 = vmatpush3.bf16.msra.mxu1 %v2841_v10  ;;  %2349 = vmatprep.subr.mxu0 %v2715_v2  ;;  %v1012_v42 = vld [vmem:[%s3106_s0] sm:$0x3]  ;;  %s2730_s28 = smov 6   ;;  %vm1943_vm13 = vcmask 64512   ;;  %vm2177_vm14 = vcmask 17408  }
   0xd   :  { %2546 = vmatprep.subr.bf16.mxu1 %v2717_v7  ;;  %552 = vrot.lane.b32.xlu0 %v550_v26, %s2719_s29  ;;  %v1474_v43 = vld [vmem:[%s3106_s0] sm:$0x3]  ;;  %s2731_s29 = smov 7  }
   0xe   :  { %783 = vrot.lane.b32.xlu1 %v781_v41, %s2720_s6  ;;  %v1243_v60 = vld [vmem:[%s3106_s0] sm:$0x3] }
   0xf   :  { %v1705_v61 = vld [vmem:[%s3106_s0] sm:$0x3]  ;;  %s2727_s0 = smov 3  }
  0x11   :  { %1245 = vrot.lane.b32.xlu0 %v1243_v60, %s2724_s23 }
  0x12   :  { %1014 = vrot.lane.b32.xlu1 %v1012_v42, %s2721_s16 }
  0x15   :  { %1707 = vrot.lane.b32.xlu0 %v1705_v61, %s2725_s24 }
  0x16   :  { %1476 = vrot.lane.b32.xlu1 %v1474_v43, %s2722_s19 }
  0x7a   :  { %v322_v25 = vpop.permute.xlu0 %321 }
  0x7f   :  { %v553_v40 = vpop.permute.xlu0 %552 }
  0x80   :  { %v784_v52 = vpop.permute.xlu1 %783 }
  0x83   :  { %v1246_v11 = vpop.permute.xlu0 %1245 }
  0x84   :  { %v1015_v53 = vpop.permute.xlu1 %1014 }
  0x88   :  { %v2933_v54 = vpop.permute.xlu1 %1476 }
  0xd9   :  { %v150_v13 = vpop.f32.mrb[0].mxu0 }
  0xda   :  { %v151_v14 = vadd.f32 %v2852_v12, %v150_v13  ;;  %v2330_v15 = vpop.f32.mrb[1].mxu0  ;;  %v2962_v13 = vpop.permute.xlu0 %1707 }
  0xdc   :  { %2639 = vtanh.f32 %v151_v14 }
  0xe6   :  { %v2640_v16 = vpop.eup %2639 }
  0xe7   :  { %2340 = vmatmul.mubr.msk.f32.vlgmr.msra.gmra.mrb[0].mxu1 %vm161_vm3, %v2640_v16 }
  0xe8   :  { %2548 = vmatpush3.bf16.msra.mxu1 %v2834_v8  ;;  %2362 = vmatprep.mubr.msk.f32.mxu1 %vm2716_vm2, %v2715_v2 }
  0xe9   :  { %2549 = vmatprep.subr.bf16.mxu1 %v2717_v7 }
  0xec   :  { %2551 = vmatpush3.bf16.msra.mxu1 %v2841_v10 }
  0xed   :  { %2555 = vmatprep.subr.bf16.mxu1 %v2717_v7 }
 0x1ba   :  { %v231_v21 = vpop.f32.mrb[0].mxu1 }
 0x1bb   :  { %v232_v22 = vadd.f32 %v2875_v20, %v231_v21  ;;  %v2341_v23 = vpop.f32.mrb[1].mxu1 }
 0x1bd   :  { %2641 = vtanh.f32 %v232_v22 }
 0x1c7   :  { %v2642_v24 = vpop.eup %2641 }
 0x1c8   :  { %2347 = vmatmul.mubr.msk.f32.vlgmr.msra.gmra.mrb[2].mxu0 %vm242_vm4, %v2642_v24 }
 0x1c9   :  { %2350 = vmatpush3.msk.msra.mxu0 %vm80_vm0, %v2809_v1  ;;  %2351 = vmatprep.mubr.msk.f32.mxu0 %vm2716_vm2, %v2715_v2 }
 0x1ca   :  { %2552 = vmatprep.subr.bf16.mxu0 %v2717_v7 }
 0x1cc   :  { %2352 = vmatmul.mubr.msk.f32.vlgmr.msra.gmra.mrb[4].mxu0 %vm76_vm1, %v322_v25 }
 0x1cd   :  { %2554 = vmatpush3.bf16.msra.mxu0 %v2868_v19  ;;  %2369 = vmatprep.mubr.msk.f32.mxu0 %vm2716_vm2, %v2715_v2 }
 0x1ce   :  { %2372 = vmatprep.subr.mxu0 %v2715_v2 }
 0x29b   :  { %v312_v28 = vpop.f32.mrb[2].mxu0 }
 0x29c   :  { %v313_v29 = vadd.f32 %v2892_v27, %v312_v28  ;;  %v2348_v30 = vpop.f32.mrb[3].mxu0 }
 0x29e   :  { %2643 = vtanh.f32 %v313_v29 }
 0x29f   :  { %v391_v31 = vpop.f32.mrb[4].mxu0 }
 0x2a0   :  { %v392_v32 = vadd.f32 %v2852_v12, %v391_v31  ;;  %v2353_v33 = vpop.f32.mrb[5].mxu0 }
 0x2a2   :  { %2645 = vtanh.f32 %v392_v32 }
 0x2a8   :  { %v2644_v34 = vpop.eup %2643 }
 0x2a9   :  { %318 = vst.msk [vmem:[#allocation2] sm:$0x3] %vm317_vm5, %v2644_v34 }
 0x2ac   :  { %v2646_v35 = vpop.eup %2645 }
 0x2ad   :  { %2363 = vmatmul.mubr.msk.f32.vlgmr.msra.gmra.mrb[2].mxu1 %vm161_vm3, %v2646_v35 }
 0x2ae   :  { %2557 = vmatpush3.bf16.msra.mxu1 %v2834_v8  ;;  %2385 = vmatprep.mubr.msk.f32.mxu1 %vm2716_vm2, %v2715_v2 }
 0x2af   :  { %2558 = vmatprep.subr.bf16.mxu1 %v2717_v7 }
 0x2b2   :  { %2560 = vmatpush3.bf16.msra.mxu1 %v2841_v10 }
 0x2b3   :  { %2564 = vmatprep.subr.bf16.mxu1 %v2717_v7 }
 0x380   :  { %v465_v36 = vpop.f32.mrb[2].mxu1 }
 0x381   :  { %v466_v37 = vadd.f32 %v2875_v20, %v465_v36  ;;  %v2364_v38 = vpop.f32.mrb[3].mxu1 }
 0x383   :  { %2647 = vtanh.f32 %v466_v37 }
 0x38d   :  { %v2648_v39 = vpop.eup %2647 }
 0x38e   :  { %2370 = vmatmul.mubr.msk.f32.vlgmr.msra.gmra.mrb[6].mxu0 %vm242_vm4, %v2648_v39 }
 0x38f   :  { %2373 = vmatpush3.msk.msra.mxu0 %vm80_vm0, %v2809_v1  ;;  %2374 = vmatprep.mubr.msk.f32.mxu0 %vm2716_vm2, %v2715_v2 }
 0x390   :  { %2561 = vmatprep.subr.bf16.mxu0 %v2717_v7 }
 0x392   :  { %2375 = vmatmul.mubr.msk.f32.vlgmr.msra.gmra.mrb[8].mxu0 %vm76_vm1, %v553_v40 }
 0x393   :  { %2563 = vmatpush3.bf16.msra.mxu0 %v2868_v19  ;;  %2392 = vmatprep.mubr.msk.f32.mxu0 %vm2716_vm2, %v2715_v2 }
 0x394   :  { %2395 = vmatprep.subr.mxu0 %v2715_v2 }
 0x461   :  { %v539_v44 = vpop.f32.mrb[6].mxu0 }
 0x462   :  { %v540_v45 = vadd.f32 %v2892_v27, %v539_v44  ;;  %v2371_v46 = vpop.f32.mrb[7].mxu0 }
 0x464   :  { %2649 = vtanh.f32 %v540_v45 }
 0x465   :  { %v622_v47 = vpop.f32.mrb[8].mxu0 }
 0x466   :  { %v623_v48 = vadd.f32 %v2852_v12, %v622_v47  ;;  %v2376_v49 = vpop.f32.mrb[9].mxu0 }
 0x468   :  { %2651 = vtanh.f32 %v623_v48 }
 0x46e   :  { %v2650_v50 = vpop.eup %2649 }
 0x46f   :  { %545 = vrot.lane.b32.xlu1 %v2650_v50, %s2723_s20 }
 0x472   :  { %v2652_v51 = vpop.eup %2651 }
 0x473   :  { %2386 = vmatmul.mubr.msk.f32.vlgmr.msra.gmra.mrb[4].mxu1 %vm161_vm3, %v2652_v51 }
 0x474   :  { %2566 = vmatpush3.bf16.msra.mxu1 %v2834_v8  ;;  %2408 = vmatprep.mubr.msk.f32.mxu1 %vm2716_vm2, %v2715_v2 }
 0x475   :  { %2567 = vmatprep.subr.bf16.mxu1 %v2717_v7 }
 0x478   :  { %2569 = vmatpush3.bf16.msra.mxu1 %v2841_v10 }
 0x479   :  { %2573 = vmatprep.subr.bf16.mxu1 %v2717_v7 }
 0x4e1   :  { %v546_v55 = vpop.permute.xlu1 %545 }
 0x4e2   :  { %549 = vst.msk [vmem:[#allocation2] sm:$0x3] %vm548_vm6, %v546_v55 }
 0x546   :  { %v696_v56 = vpop.f32.mrb[4].mxu1 }
 0x547   :  { %v697_v57 = vadd.f32 %v2875_v20, %v696_v56  ;;  %v2387_v58 = vpop.f32.mrb[5].mxu1 }
 0x549   :  { %2653 = vtanh.f32 %v697_v57 }
 0x553   :  { %v2654_v59 = vpop.eup %2653 }
 0x554   :  { %2393 = vmatmul.mubr.msk.f32.vlgmr.msra.gmra.mrb[10].mxu0 %vm242_vm4, %v2654_v59 }
 0x555   :  { %2396 = vmatpush3.msk.msra.mxu0 %vm80_vm0, %v2809_v1  ;;  %2397 = vmatprep.mubr.msk.f32.mxu0 %vm2716_vm2, %v2715_v2 }
 0x556   :  { %2570 = vmatprep.subr.bf16.mxu0 %v2717_v7 }
 0x558   :  { %2398 = vmatmul.mubr.msk.f32.vlgmr.msra.gmra.mrb[12].mxu0 %vm76_vm1, %v784_v52 }
 0x559   :  { %2572 = vmatpush3.bf16.msra.mxu0 %v2868_v19  ;;  %2415 = vmatprep.mubr.msk.f32.mxu0 %vm2716_vm2, %v2715_v2 }
 0x55a   :  { %2418 = vmatprep.subr.mxu0 %v2715_v2 }
 0x627   :  { %v770_v62 = vpop.f32.mrb[10].mxu0 }
 0x628   :  { %v771_v63 = vadd.f32 %v2892_v27, %v770_v62  ;;  %v2394_v0 = vpop.f32.mrb[11].mxu0 }
 0x62a   :  { %2655 = vtanh.f32 %v771_v63 }
 0x62b   :  { %v853_v3 = vpop.f32.mrb[12].mxu0 }
 0x62c   :  { %v854_v4 = vadd.f32 %v2852_v12, %v853_v3  ;;  %v2399_v5 = vpop.f32.mrb[13].mxu0 }
 0x62e   :  { %2657 = vtanh.f32 %v854_v4 }
 0x634   :  { %v2656_v6 = vpop.eup %2655 }
 0x635   :  { %776 = vrot.lane.b32.xlu0 %v2656_v6, %s2726_s25 }
 0x638   :  { %v2658_v9 = vpop.eup %2657 }
 0x639   :  { %2409 = vmatmul.mubr.msk.f32.vlgmr.msra.gmra.mrb[6].mxu1 %vm161_vm3, %v2658_v9 }
 0x63a   :  { %2575 = vmatpush3.bf16.msra.mxu1 %v2834_v8  ;;  %2431 = vmatprep.mubr.msk.f32.mxu1 %vm2716_vm2, %v2715_v2 }
 0x63b   :  { %2576 = vmatprep.subr.bf16.mxu1 %v2717_v7 }
 0x63e   :  { %2578 = vmatpush3.bf16.msra.mxu1 %v2841_v10 }
 0x63f   :  { %2582 = vmatprep.subr.bf16.mxu1 %v2717_v7 }
 0x6a7   :  { %v777_v14 = vpop.permute.xlu0 %776 }
 0x6a8   :  { %780 = vst.msk [vmem:[#allocation2] sm:$0x3] %vm779_vm7, %v777_v14  ;;  %v54_v14 = vld [vmem:[%s3113_s7] sm:$0xff] }
 0x70c   :  { %v927_v15 = vpop.f32.mrb[6].mxu1 }
 0x70d   :  { %v928_v16 = vadd.f32 %v2875_v20, %v927_v15  ;;  %v2410_v17 = vpop.f32.mrb[7].mxu1 }
 0x70e   :  { %v56_v17 = vld [vmem:[%s3115_s9 + $0x8] sm:$0xff] }
 0x70f   :  { %2659 = vtanh.f32 %v928_v16 }
 0x719   :  { %v2660_v18 = vpop.eup %2659 }
 0x71a   :  { %2416 = vmatmul.mubr.msk.f32.vlgmr.msra.gmra.mrb[14].mxu0 %vm242_vm4, %v2660_v18  ;;  %v57_v18 = vld [vmem:[%s3115_s9 + $0x10] sm:$0xff] }
 0x71b   :  { %2419 = vmatpush3.msk.msra.mxu0 %vm80_vm0, %v2809_v1  ;;  %2420 = vmatprep.mubr.msk.f32.mxu0 %vm2716_vm2, %v2715_v2 }
 0x71c   :  { %2579 = vmatprep.subr.bf16.mxu0 %v2717_v7 }
 0x71e   :  { %2421 = vmatmul.mubr.msk.f32.vlgmr.msra.gmra.mrb[16].mxu0 %vm76_vm1, %v1015_v53 }
 0x71f   :  { %2581 = vmatpush3.bf16.msra.mxu0 %v2868_v19  ;;  %2438 = vmatprep.mubr.msk.f32.mxu0 %vm2716_vm2, %v2715_v2 }
 0x720   :  { %2441 = vmatprep.subr.mxu0 %v2715_v2 }
 0x7ed   :  { %v1001_v21 = vpop.f32.mrb[14].mxu0 }
 0x7ee   :  { %v1002_v22 = vadd.f32 %v2892_v27, %v1001_v21  ;;  %v2417_v23 = vpop.f32.mrb[15].mxu0 }
 0x7f0   :  { %2661 = vtanh.f32 %v1002_v22  ;;  %v58_v22 = vld [vmem:[%s3115_s9 + $0x18] sm:$0xff] }
 0x7f1   :  { %v1084_v24 = vpop.f32.mrb[16].mxu0  ;;  %v2613_v23 = vpack.c.bf16 %v58_v22, %v57_v18 }
 0x7f2   :  { %v1085_v25 = vadd.f32 %v2852_v12, %v1084_v24  ;;  %v2422_v26 = vpop.f32.mrb[17].mxu0 }
 0x7f4   :  { %2663 = vtanh.f32 %v1085_v25 }
 0x7fa   :  { %v2662_v28 = vpop.eup %2661 }
 0x7fb   :  { %1007 = vrot.lane.b32.xlu1 %v2662_v28, %s2727_s0 }
 0x7fe   :  { %v2664_v29 = vpop.eup %2663 }
 0x7ff   :  { %2432 = vmatmul.mubr.msk.f32.vlgmr.msra.gmra.mrb[8].mxu1 %vm161_vm3, %v2664_v29  ;;  %v59_v29 = vld [vmem:[%s3117_s11] sm:$0xff] }
 0x800   :  { %2584 = vmatpush3.bf16.msra.mxu1 %v2834_v8  ;;  %2454 = vmatprep.mubr.msk.f32.mxu1 %vm2716_vm2, %v2715_v2 }
 0x801   :  { %2585 = vmatprep.subr.bf16.mxu1 %v2717_v7 }
 0x804   :  { %2587 = vmatpush3.bf16.msra.mxu1 %v2841_v10 }
 0x805   :  { %2591 = vmatprep.subr.bf16.mxu1 %v2717_v7 }
 0x86d   :  { %v1008_v30 = vpop.permute.xlu1 %1007 }
 0x86e   :  { %1011 = vst.msk [vmem:[#allocation2] sm:$0x3] %vm1010_vm8, %v1008_v30  ;;  %v60_v30 = vld [vmem:[%s3117_s11 + $0x8] sm:$0xff] }
 0x8d2   :  { %v1158_v31 = vpop.f32.mrb[8].mxu1 }
 0x8d3   :  { %v1159_v32 = vadd.f32 %v2875_v20, %v1158_v31  ;;  %v2433_v33 = vpop.f32.mrb[9].mxu1  ;;  %v61_v31 = vld [vmem:[%s3117_s11 + $0x10] sm:$0xff] }
 0x8d4   :  { %v62_v33 = vld [vmem:[%s3117_s11 + $0x18] sm:$0xff]  ;;  %s2732_s11 = smov [#allocation4]  }
 0x8d5   :  { %2665 = vtanh.f32 %v1159_v32  ;;  %v2616_v32 = vpack.c.bf16 %v60_v30, %v59_v29 }
 0x8df   :  { %v2666_v34 = vpop.eup %2665 }
 0x8e0   :  { %2439 = vmatmul.mubr.msk.f32.vlgmr.msra.gmra.mrb[18].mxu0 %vm242_vm4, %v2666_v34  ;;  %v2619_v34 = vpack.c.bf16 %v62_v33, %v61_v31 }
 0x8e1   :  { %2442 = vmatpush3.msk.msra.mxu0 %vm80_vm0, %v2809_v1  ;;  %2443 = vmatprep.mubr.msk.f32.mxu0 %vm2716_vm2, %v2715_v2 }
 0x8e2   :  { %2588 = vmatprep.subr.bf16.mxu0 %v2717_v7 }
 0x8e4   :  { %2444 = vmatmul.mubr.msk.f32.vlgmr.msra.gmra.mrb[20].mxu0 %vm76_vm1, %v1246_v11 }
 0x8e5   :  { %2590 = vmatpush3.bf16.msra.mxu0 %v2868_v19  ;;  %2461 = vmatprep.mubr.msk.f32.mxu0 %vm2716_vm2, %v2715_v2 }
 0x8e6   :  { %2464 = vmatprep.subr.mxu0 %v2715_v2 }
 0x9b3   :  { %v1232_v35 = vpop.f32.mrb[18].mxu0 }
 0x9b4   :  { %v1233_v36 = vadd.f32 %v2892_v27, %v1232_v35  ;;  %v2440_v37 = vpop.f32.mrb[19].mxu0  ;;  %v2230_v35 = vld [vmem:[%s3116_s10] ss:$0 sm:$0xff] }
 0x9b6   :  { %2667 = vtanh.f32 %v1233_v36 }
 0x9b7   :  { %v1315_v38 = vpop.f32.mrb[20].mxu0 }
 0x9b8   :  { %v1316_v39 = vadd.f32 %v2852_v12, %v1315_v38  ;;  %v2445_v40 = vpop.f32.mrb[21].mxu0 }
 0x9b9   :  { %v2232_v40 = vld [vmem:[%s3118_s12] ss:$0 sm:$0xff] }
 0x9ba   :  { %2669 = vtanh.f32 %v1316_v39 }
 0x9c0   :  { %v2668_v41 = vpop.eup %2667 }
 0x9c1   :  { %1238 = vrot.lane.b32.xlu0 %v2668_v41, %s2728_s26 }
 0x9c4   :  { %v2670_v42 = vpop.eup %2669 }
 0x9c5   :  { %2455 = vmatmul.mubr.msk.f32.vlgmr.msra.gmra.mrb[10].mxu1 %vm161_vm3, %v2670_v42 }
 0x9c6   :  { %2593 = vmatpush3.bf16.msra.mxu1 %v2834_v8  ;;  %2477 = vmatprep.mubr.msk.f32.mxu1 %vm2716_vm2, %v2715_v2 }
 0x9c7   :  { %2594 = vmatprep.subr.bf16.mxu1 %v2717_v7 }
 0x9ca   :  { %2596 = vmatpush3.bf16.msra.mxu1 %v2841_v10 }
 0x9cb   :  { %2600 = vmatprep.subr.bf16.mxu1 %v2717_v7 }
 0xa33   :  { %v1239_v43 = vpop.permute.xlu0 %1238 }
 0xa34   :  { %1242 = vst.msk [vmem:[#allocation2] sm:$0x3] %vm1241_vm9, %v1239_v43 }
 0xa98   :  { %v1389_v44 = vpop.f32.mrb[10].mxu1 }
 0xa99   :  { %v1390_v45 = vadd.f32 %v2875_v20, %v1389_v44  ;;  %v2456_v46 = vpop.f32.mrb[11].mxu1 }
 0xa9b   :  { %2671 = vtanh.f32 %v1390_v45 }
 0xaa5   :  { %v2672_v47 = vpop.eup %2671 }
 0xaa6   :  { %2462 = vmatmul.mubr.msk.f32.vlgmr.msra.gmra.mrb[22].mxu0 %vm242_vm4, %v2672_v47 }
 0xaa7   :  { %2465 = vmatpush3.msk.msra.mxu0 %vm80_vm0, %v2809_v1  ;;  %2466 = vmatprep.mubr.msk.f32.mxu0 %vm2716_vm2, %v2715_v2 }
 0xaa8   :  { %2597 = vmatprep.subr.bf16.mxu0 %v2717_v7 }
 0xaaa   :  { %2467 = vmatmul.mubr.msk.f32.vlgmr.msra.gmra.mrb[24].mxu0 %vm76_vm1, %v2933_v54 }
 0xaab   :  { %2599 = vmatpush3.bf16.msra.mxu0 %v2868_v19  ;;  %2484 = vmatprep.mubr.msk.f32.mxu0 %vm2716_vm2, %v2715_v2 }
 0xaac   :  { %2487 = vmatprep.subr.mxu0 %v2715_v2 }
 0xb79   :  { %v1463_v48 = vpop.f32.mrb[22].mxu0 }
 0xb7a   :  { %v1464_v49 = vadd.f32 %v2892_v27, %v1463_v48  ;;  %v2463_v50 = vpop.f32.mrb[23].mxu0 }
 0xb7c   :  { %2673 = vtanh.f32 %v1464_v49 }
 0xb7d   :  { %v1546_v51 = vpop.f32.mrb[24].mxu0 }
 0xb7e   :  { %v1547_v52 = vadd.f32 %v2852_v12, %v1546_v51  ;;  %v2468_v53 = vpop.f32.mrb[25].mxu0 }
 0xb80   :  { %2675 = vtanh.f32 %v1547_v52 }
 0xb86   :  { %v2674_v55 = vpop.eup %2673 }
 0xb87   :  { %1469 = vrot.lane.b32.xlu1 %v2674_v55, %s2729_s27  ;;  %s2185_s27 = sshll.u32 %s2732_s11, 4  ;;  %s2186_s27 = int_to_ptr.vmem [resolvable:$true] %s2185_s27 }
 0xb88   :  { %s2691_s10 = scalar_lea.vmem %s2186_s27, 32  ;;  %p2696_p1 = scmp.lt.s32.totalorder %s2186_s27, %s2186_s27 }
 0xb89   :  { %p2692_p0 = scmp.ne.s32.totalorder %s2186_s27, %s2691_s10  ;;  %p2697_p2 = scmp.lt.s32.totalorder %s2691_s10, %s2691_s10 }
 0xb8a   :  { %v2676_v54 = vpop.eup %2675 }
 0xb8b   :  { %2478 = vmatmul.mubr.msk.f32.vlgmr.msra.gmra.mrb[12].mxu1 %vm161_vm3, %v2676_v54  ;;  %p2698_p3 = por %p2697_p2, %p2696_p1 }
 0xb8c   :  { %2602 = vmatpush3.bf16.msra.mxu1 %v2834_v8  ;;  %2500 = vmatprep.mubr.msk.f32.mxu1 %vm2716_vm2, %v2715_v2 }
 0xb8d   :  { %2603 = vmatprep.subr.bf16.mxu1 %v2717_v7  ;;  %p2699_p4 = pnand %p2698_p3, %p2692_p0 }
 0xb90   :  { %2605 = vmatpush3.bf16.msra.mxu1 %v2841_v10 }
 0xb91   :  { %2609 = vmatprep.subr.bf16.mxu1 %v2717_v7 }
 0xbf9   :  { %v1470_v56 = vpop.permute.xlu1 %1469 }
 0xbfa   :  { %1473 = vst.msk [vmem:[#allocation2] sm:$0x3] %vm1472_vm10, %v1470_v56 }
 0xc5e   :  { %v1620_v57 = vpop.f32.mrb[12].mxu1 }
 0xc5f   :  { %v1621_v58 = vadd.f32 %v2875_v20, %v1620_v57  ;;  %v2479_v59 = vpop.f32.mrb[13].mxu1 }
 0xc61   :  { %2677 = vtanh.f32 %v1621_v58 }
 0xc6b   :  { %v2678_v60 = vpop.eup %2677 }
 0xc6c   :  { %2485 = vmatmul.mubr.msk.f32.vlgmr.msra.gmra.mrb[26].mxu0 %vm242_vm4, %v2678_v60 }
 0xc6d   :  { %2488 = vmatpush3.msk.msra.mxu0 %vm80_vm0, %v2809_v1  ;;  %2489 = vmatprep.mubr.msk.f32.mxu0 %vm2716_vm2, %v2715_v2 }
 0xc6e   :  { %2606 = vmatprep.subr.bf16.mxu0 %v2717_v7 }
 0xc70   :  { %2490 = vmatmul.mubr.msk.f32.vlgmr.msra.gmra.mrb[28].mxu0 %vm76_vm1, %v2962_v13 }
 0xc71   :  { %2608 = vmatpush3.bf16.msra.mxu0 %v2868_v19  ;;  %2507 = vmatprep.mubr.msk.f32.mxu0 %vm2716_vm2, %v2715_v2 }
 0xc72   :  { %2510 = vmatprep.subr.mxu0 %v2715_v2 }
 0xd3f   :  { %v1694_v8 = vpop.f32.mrb[26].mxu0 }
 0xd40   :  { %v1695_v10 = vadd.f32 %v2892_v27, %v1694_v8  ;;  %v2486_v61 = vpop.f32.mrb[27].mxu0 }
 0xd42   :  { %2679 = vtanh.f32 %v1695_v10 }
 0xd43   :  { %v1777_v1 = vpop.f32.mrb[28].mxu0 }
 0xd44   :  { %v1778_v62 = vadd.f32 %v2852_v12, %v1777_v1  ;;  %v2491_v63 = vpop.f32.mrb[29].mxu0 }
 0xd46   :  { %2681 = vtanh.f32 %v1778_v62 }
 0xd4c   :  { %v2680_v0 = vpop.eup %2679 }
 0xd4d   :  { %1700 = vrot.lane.b32.xlu0 %v2680_v0, %s2730_s28 }
 0xd50   :  { %v2682_v3 = vpop.eup %2681 }
 0xd51   :  { %2501 = vmatmul.mubr.msk.f32.vlgmr.msra.gmra.mrb[14].mxu1 %vm161_vm3, %v2682_v3 }
 0xd52   :  { %2523 = vmatprep.mubr.msk.f32.mxu1 %vm2716_vm2, %v2715_v2 }
 0xdbf   :  { %v1701_v19 = vpop.permute.xlu0 %1700 }
 0xdc0   :  { %1704 = vst.msk [vmem:[#allocation2] sm:$0x3] %vm1703_vm11, %v1701_v19 }
 0xe24   :  { %v1851_v4 = vpop.f32.mrb[14].mxu1 }
 0xe25   :  { %v1852_v5 = vadd.f32 %v2875_v20, %v1851_v4  ;;  %v2502_v6 = vpop.f32.mrb[15].mxu1 }
 0xe27   :  { %2683 = vtanh.f32 %v1852_v5 }
 0xe31   :  { %v2684_v12 = vpop.eup %2683 }
 0xe32   :  { %2508 = vmatmul.mubr.msk.f32.vlgmr.msra.gmra.mrb[30].mxu0 %vm242_vm4, %v2684_v12 }
 0xe33   :  { %2512 = vmatprep.mubr.msk.f32.mxu0 %vm2716_vm2, %v2715_v2  ;;  %2511 = vmatpush3.msra.mxu0 %v54_v14 }
 0xe34   :  { %2615 = vmatprep.subr.bf16.mxu0 %v2717_v7 }
 0xf05   :  { %v1925_v9 = vpop.f32.mrb[30].mxu0 }
 0xf06   :  { %v1926_v11 = vadd.f32 %v2892_v27, %v1925_v9  ;;  %v2509_v13 = vpop.f32.mrb[31].mxu0  ;;  %v55_v27 = vld [vmem:[%s3115_s9] sm:$0xff] }
 0xf07   :  { %v2610_v21 = vpack.c.bf16 %v56_v17, %v55_v27 }
 0xf08   :  { %2685 = vtanh.f32 %v1926_v11 }
 0xf09   :  { %2611 = vmatpush3.bf16.msra.mxu1 %v2610_v21 }
 0xf0a   :  { %2612 = vmatprep.subr.bf16.mxu1 %v2717_v7 }
 0xf0d   :  { %2614 = vmatpush3.bf16.msra.mxu1 %v2613_v23 }
 0xf12   :  { %v2686_v20 = vpop.eup %2685 }
 0xf13   :  { %1931 = vrot.lane.b32.xlu1 %v2686_v20, %s2731_s29 }
 0xf85   :  { %v1932_v15 = vpop.permute.xlu1 %1931 }
 0xf86   :  { %1935 = vst.msk [vmem:[#allocation2] sm:$0x3] %vm1934_vm12, %v1932_v15 }
 0xf8d   :  { %v1936_v16 = vld [vmem:[#allocation2] sm:$0x3] }
 0xf8e   :  { %2513 = vmatmul.mubr.msk.f32.vlgmr.msra.gmra.mrb[32].mxu0 %vm1943_vm13, %v1936_v16 }
 0xf8f   :  { %2534 = vmatprep.mubr.msk.f32.mxu0 %vm2716_vm2, %v2715_v2  ;;  %v2228_v2 = vld [vmem:[%s3114_s8] ss:$0 sm:$0xff]  ;;  %2617 = vmatpush3.bf16.msra.mxu0 %v2616_v32 }
 0xf90   :  { %2618 = vmatprep.subr.bf16.mxu0 %v2717_v7 }
 0xf93   :  { %2620 = vmatpush3.bf16.msra.mxu0 %v2619_v34 }
0x1061   :  { %v2013_v24 = vpop.f32.mrb[32].mxu0 }
0x1062   :  { %v2014_v25 = vadd.f32 %v2228_v2, %v2013_v24  ;;  %v2514_v26 = vpop.f32.mrb[33].mxu0 }
0x1064   :  { %2687 = vtanh.f32 %v2014_v25 }
0x106e   :  { %v2688_v28 = vpop.eup %2687 }
0x106f   :  { %2524 = vmatmul.mubr.msk.f32.vlgmr.msra.gmra.mrb[16].mxu1 %vm161_vm3, %v2688_v28 }
0x1142   :  { %v2093_v36 = vpop.f32.mrb[16].mxu1 }
0x1143   :  { %v2094_v37 = vadd.f32 %v2230_v35, %v2093_v36  ;;  %v2525_v38 = vpop.f32.mrb[17].mxu1 }
0x1145   :  { %2689 = vtanh.f32 %v2094_v37 }
0x114f   :  { %v2690_v39 = vpop.eup %2689 }
0x1150   :  { %2535 = vmatmul.mubr.msk.f32.vlgmr.msra.gmra.mrb[34].mxu0 %vm161_vm3, %v2690_v39 }
0x1223   :  { %v2173_v41 = vpop.f32.mrb[34].mxu0 }
0x1224   :  { %v2174_v7 = vadd.f32 %v2232_v40, %v2173_v41  ;;  %v2536_v42 = vpop.f32.mrb[35].mxu0 }
0x1226   :  { %2178 = vst.msk [vmem:[#allocation4] sm:$0x3] %vm2177_vm14, %v2174_v7 }
0x1227   :  { %2702 = shalt.err (!%p2699_p4)
}
0x1228   :  { %s2703_s5 = scalar_lea.hbm %s3119_s13, 32 }
0x1229   :  { %p2704_p5 = scmp.ne.s32.totalorder %s3119_s13, %s2703_s5  ;;  %p2707_p6 = scmp.lt.u32.totalorder %s2703_s5, %s3119_s13 }
0x122b   :  { %p2709_p7 = pnand %p2707_p6, %p2704_p5 }
0x122d   :  { %2712 = shalt.err (!%p2709_p7)
}
0x122e   :  { %2188 = dma.vmem_to_hbm [thread:$0]  %s2186_s27, 32, %s3119_s13, [#allocation5]  }
0x122f   :  { %2713 = dma.done.wait [#allocation5], 32  }
0x1230   :  { %2714 = vsyncadd [#allocation5], 4294967264 }
0x1231   :  { %2192 = vsyncpa [#allocation5], 1 }

</bundles_post_ra>
